<compile_context>
chip_gen: v7x
topology: tpu7x:2x2x1
jax: 0.10.0
libtpu: 0.0.40
codegen_flags: <defaults>
</compile_context>

<pallas_src>
import functools

import jax
import jax.numpy as jnp
import numpy as np
from jax import lax
from jax.experimental import pallas as pl
from jax.experimental.pallas import tpu as pltpu


# ----------------------------------------------------------------------------
# helpers
# ----------------------------------------------------------------------------
def _pick_block(n, cap):
    """Largest block <= cap that is either the full extent n (always legal for a
    BlockSpec) or a multiple of 8 that divides n (satisfies the (8,128) rule).
    NOTE: falls back to the full extent when no such divisor exists (e.g. prime n)."""
    if n <= cap:
        return n
    start = cap - (cap % 8)
    for t in range(start, 0, -8):
        if n % t == 0:
            return t
    return n


# ----------------------------------------------------------------------------
# fused LSTM-layer kernel: input projection + serial recurrence in one kernel
# ----------------------------------------------------------------------------
def _lstm_fused_kernel(x_ref, w_ref, u_ref, b_ref, out_ref,
                       h_ref, c_ref, xw_ref, *,
                       hidden_size, block_b, block_t, unroll):
    """
    x_ref  : (bb, bt, D)    input block for this (batch-block, time-block)
    w_ref  : (D, 4H)        fused input weights  (resident, maybe bf16)
    u_ref  : (H, 4H)        fused recurrent weights (resident, maybe bf16)
    b_ref  : (1, 4H)        fused bias (fp32, resident)
    out_ref: (bb, bt, H)    hidden states for this block
    h_ref, c_ref : (bb, H)  fp32 VMEM carries, persist across (sequential) time blocks
    xw_ref : (bb, bt, 4H)   fp32 VMEM staging for x@W + b of this block
    """
    H = hidden_size
    t_blk = pl.program_id(1)

    @pl.when(t_blk == 0)
    def _():
        h_ref[...] = jnp.zeros_like(h_ref)
        c_ref[...] = jnp.zeros_like(c_ref)

    mx_dtype = w_ref.dtype  # fp32 by default; bf16 when the wrapper casts the weights

    # ---- 1) fused input projection: one MXU matmul for the whole block ----
    D = x_ref.shape[-1]
    x2 = x_ref[...].reshape(block_b * block_t, D).astype(mx_dtype)
    xw = jnp.dot(x2, w_ref[...], preferred_element_type=jnp.float32) + b_ref[...]
    xw_ref[...] = xw.reshape(block_b, block_t, 4 * H)

    u = u_ref[...]

    # ---- 2) serial recurrence: fori_loop over chunks, chunk statically unrolled ----
    n_chunks = block_t // unroll

    def chunk_body(ci, carry):
        h, c = carry
        start = pl.multiple_of(ci * unroll, unroll)
        xw_chunk = xw_ref[:, pl.ds(start, unroll), :]        # (bb, unroll, 4H)
        hs = []
        for j in range(unroll):
            gates = xw_chunk[:, j, :] + jnp.dot(
                h.astype(mx_dtype), u, preferred_element_type=jnp.float32)
            # fused sigmoid over the contiguous [i | f | o] columns (one EUP pass)
            sfo = jax.nn.sigmoid(gates[:, :3 * H])
            i_g = sfo[:, 0 * H:1 * H]
            f_g = sfo[:, 1 * H:2 * H]
            o_g = sfo[:, 2 * H:3 * H]
            c_tilda = jnp.tanh(gates[:, 3 * H:4 * H])
            c = f_g * c + i_g * c_tilda
            h = o_g * jnp.tanh(c)
            hs.append(h)
        # one dense (bb, unroll, H) store per chunk instead of per-step masked stores
        out_ref[:, pl.ds(start, unroll), :] = jnp.stack(hs, axis=1)
        return (h, c)

    h, c = lax.fori_loop(0, n_chunks, chunk_body, (h_ref[...], c_ref[...]))
    h_ref[...] = h
    c_ref[...] = c


def lstm_layer_pallas(x_btd, w4, u4, b4, *, matmul_bf16=False):
    """One MyLSTMCell layer over a full sequence (h0 = c0 = 0).

    x_btd: (B, T, D) fp32; w4: (D, 4H); u4: (H, 4H); b4: (1, 4H). Returns (B, T, H) fp32.
    """
    B, T, D = x_btd.shape
    H = u4.shape[0]
    G = 4 * H

    if matmul_bf16:
        # v6e / v7x MXU peak is bf16; keep accumulation + gate math in fp32.
        w4 = w4.astype(jnp.bfloat16)
        u4 = u4.astype(jnp.bfloat16)

    bt = _pick_block(T, 128)               # time steps per grid step (amortize ~0.35us/step)
    # Keep >=2 batch blocks when possible so v7x's second TensorCore can take a
    # disjoint batch slice of the serial recurrence ("parallel" axis below).
    bb = B // 2 if (B >= 2 and B % 2 == 0) else B
    unroll = 8 if bt % 8 == 0 else bt      # static inner unroll = one dense store

    kernel = functools.partial(
        _lstm_fused_kernel,
        hidden_size=H, block_b=bb, block_t=bt, unroll=unroll)

    return pl.pallas_call(
        kernel,
        out_shape=jax.ShapeDtypeStruct((B, T, H), jnp.float32),
        grid_spec=pltpu.PrefetchScalarGridSpec(
            num_scalar_prefetch=0,
            grid=(B // bb, T // bt),
            in_specs=[
                pl.BlockSpec((bb, bt, D), lambda b, t: (b, t, 0)),   # x block
                pl.BlockSpec((D, G), lambda b, t: (0, 0)),           # fused W (resident)
                pl.BlockSpec((H, G), lambda b, t: (0, 0)),           # fused U (resident)
                pl.BlockSpec((1, G), lambda b, t: (0, 0)),           # fused bias (resident)
            ],
            out_specs=pl.BlockSpec((bb, bt, H), lambda b, t: (b, t, 0)),
            scratch_shapes=[
                pltpu.VMEM((bb, H), jnp.float32),        # h carry
                pltpu.VMEM((bb, H), jnp.float32),        # c carry
                pltpu.VMEM((bb, bt, G), jnp.float32),    # staged x@W + b for this block
            ],
        ),
        compiler_params=pltpu.CompilerParams(
            # batch blocks are independent (megacore); time is strictly sequential
            dimension_semantics=("parallel", "arbitrary"),
            vmem_limit_bytes=32 * 1024 * 1024,
        ),
    )(x_btd, w4, u4, b4)


# ----------------------------------------------------------------------------
# parameters & forward
# ----------------------------------------------------------------------------
def init_mylstm_params(key, input_size, hidden_layer_sizes):
    """Deterministic parameter init mirroring MyLSTMCell.__init__ (full-rank path),
    with the 4 gates fused along the last axis: columns [i | f | o | c]."""
    params = []
    in_size = input_size
    for hidden_size in hidden_layer_sizes:
        key, kw, ku = jax.random.split(key, 3)
        w4 = 0.1 * jax.random.normal(kw, (in_size, 4 * hidden_size), jnp.float32)      # w1..w4
        u4 = 0.1 * jax.random.normal(ku, (hidden_size, 4 * hidden_size), jnp.float32)  # u1..u4
        b4 = jnp.ones((1, 4 * hidden_size), jnp.float32)                               # bias_i,f,o,c = 1
        params.append((w4, u4, b4))
        in_size = hidden_size
    return params


@functools.partial(jax.jit, static_argnames=("matmul_bf16",))
def mylstm_forward(x_btd, params, matmul_bf16=False):
    """MyLSTM.forward (batch_first=True).

    x_btd: (B, T, D_in)
    returns (out: (B, T, H_last), hiddens_cat: (B, sum(H_l)))
    """
    x = x_btd
    hiddens = []
    for (w4, u4, b4) in params:
        x = lstm_layer_pallas(x, w4, u4, b4, matmul_bf16=matmul_bf16)  # (B, T, H)
        hiddens.append(x[:, -1, :])                                    # final h of this layer
    return x, jnp.concatenate(hiddens, axis=-1)


def _mylstm_forward_ref(x_btd, params):
    """Pure-JAX reference of the PyTorch forward (for sanity checking)."""
    x = x_btd
    hiddens = []
    for (w4, u4, b4) in params:
        B = x.shape[0]
        H = u4.shape[0]
        h = jnp.zeros((B, H), jnp.float32)
        c = jnp.zeros((B, H), jnp.float32)
        outs = []
        for t in range(x.shape[1]):
            xt = x[:, t, :]
            g = xt @ w4 + h @ u4 + b4
            i = jax.nn.sigmoid(g[:, 0:H])
            f = jax.nn.sigmoid(g[:, H:2 * H])
            o = jax.nn.sigmoid(g[:, 2 * H:3 * H])
            ct = jnp.tanh(g[:, 3 * H:4 * H])
            c = f * c + i * ct
            h = o * jnp.tanh(c)
            outs.append(h)
        x = jnp.stack(outs, axis=1)
        hiddens.append(h)
    return x, jnp.concatenate(hiddens, axis=-1)


if __name__ == "__main__":
    B, T, D = 2, 8, 16
    hidden_layer_sizes = [32, 32]

    key = jax.random.PRNGKey(0)
    kx, kp = jax.random.split(key)
    x = jax.random.normal(kx, (B, T, D), jnp.float32)
    params = init_mylstm_params(kp, D, hidden_layer_sizes)

    # fp32 path (exact semantics)
    out, hiddens = mylstm_forward(x, params)
    out = jax.block_until_ready(out)
    hiddens = jax.block_until_ready(hiddens)

    out_ref, hid_ref = _mylstm_forward_ref(x, params)
    np.testing.assert_allclose(np.asarray(out), np.asarray(out_ref), rtol=1e-5, atol=1e-5)
    np.testing.assert_allclose(np.asarray(hiddens), np.asarray(hid_ref), rtol=1e-5, atol=1e-5)

    assert out.shape == (B, T, hidden_layer_sizes[-1])
    assert hiddens.shape == (B, sum(hidden_layer_sizes))

    # bf16-MXU path (v6e/v7x optimization): fp32 accumulate + fp32 gate math, loose check
    out_bf, hid_bf = mylstm_forward(x, params, matmul_bf16=True)
    out_bf = jax.block_until_ready(out_bf)
    hid_bf = jax.block_until_ready(hid_bf)
    np.testing.assert_allclose(np.asarray(out_bf), np.asarray(out_ref), rtol=1e-1, atol=1e-1)
    np.testing.assert_allclose(np.asarray(hid_bf), np.asarray(hid_ref), rtol=1e-1, atol=1e-1)

    print("KERNEL_OK")
</pallas_src>

<mosaic_0001>
module attributes {stable_mosaic.version = 11 : i64} {
  func.func @_lstm_fused_kernel(%arg0: i32, %arg1: i32, %arg2: memref<1x8x32xf32, #tpu.memory_space<vmem>>, %arg3: memref<32x128xf32, #tpu.memory_space<vmem>>, %arg4: memref<32x128xf32, #tpu.memory_space<vmem>>, %arg5: memref<1x128xf32, #tpu.memory_space<vmem>>, %arg6: memref<1x8x32xf32, #tpu.memory_space<vmem>>, %arg7: memref<1x32xf32, #tpu.memory_space<vmem>>, %arg8: memref<1x32xf32, #tpu.memory_space<vmem>>, %arg9: memref<1x8x128xf32, #tpu.memory_space<vmem>>) attributes {dimension_semantics = [#tpu.dimension_semantics<parallel>, #tpu.dimension_semantics<arbitrary>], iteration_bounds = array<i64: 2, 1>, scalar_prefetch = 0 : i64, scratch_operands = 3 : i64, tpu.core_type = #tpu.core_type<tc>, window_params = [{transform_indices = @transform_0, window_bounds = array<i64: 1, 8, 32>}, {pipeline_mode = #tpu.pipeline_mode<synchronous>, transform_indices = @transform_1, window_bounds = array<i64: 32, 128>}, {pipeline_mode = #tpu.pipeline_mode<synchronous>, transform_indices = @transform_2, window_bounds = array<i64: 32, 128>}, {pipeline_mode = #tpu.pipeline_mode<synchronous>, transform_indices = @transform_3, window_bounds = array<i64: 1, 128>}, {transform_indices = @transform_4, window_bounds = array<i64: 1, 8, 32>}]} {
    %c0_i32 = arith.constant 0 : i32
    %0 = arith.cmpi eq, %arg1, %c0_i32 : i32
    %1 = arith.extui %0 : i1 to i32
    %c0_i32_0 = arith.constant 0 : i32
    %2 = arith.cmpi ne, %1, %c0_i32_0 : i32
    scf.if %2 {
      %cst_41 = arith.constant 0.000000e+00 : f32
      %192 = vector.broadcast %cst_41 : f32 to vector<1x32xf32>
      %c0_42 = arith.constant 0 : index
      %c0_43 = arith.constant 0 : index
      %193 = vector.load %arg7[%c0_42, %c0_43] : memref<1x32xf32, #tpu.memory_space<vmem>>, vector<1x32xf32>
      tpu.vector_store %arg7[%c0_42, %c0_43], %192 {strides = array<i32>} : memref<1x32xf32, #tpu.memory_space<vmem>>, vector<1x32xf32>,
      %cst_44 = arith.constant 0.000000e+00 : f32
      %194 = vector.broadcast %cst_44 : f32 to vector<1x32xf32>
      %c0_45 = arith.constant 0 : index
      %c0_46 = arith.constant 0 : index
      %195 = vector.load %arg8[%c0_45, %c0_46] : memref<1x32xf32, #tpu.memory_space<vmem>>, vector<1x32xf32>
      tpu.vector_store %arg8[%c0_45, %c0_46], %194 {strides = array<i32>} : memref<1x32xf32, #tpu.memory_space<vmem>>, vector<1x32xf32>,
    } else {
    }
    %c0 = arith.constant 0 : index
    %c0_1 = arith.constant 0 : index
    %c0_2 = arith.constant 0 : index
    %3 = vector.load %arg2[%c0, %c0_1, %c0_2] : memref<1x8x32xf32, #tpu.memory_space<vmem>>, vector<1x8x32xf32>
    %4 = vector.shape_cast %3 : vector<1x8x32xf32> to vector<8x32xf32>
    %c0_3 = arith.constant 0 : index
    %c0_4 = arith.constant 0 : index
    %5 = vector.load %arg3[%c0_3, %c0_4] : memref<32x128xf32, #tpu.memory_space<vmem>>, vector<32x128xf32>
    %cst = arith.constant dense<0.000000e+00> : vector<8x128xf32>
    %6 = tpu.matmul %4, %5, %cst {dimension_numbers = #tpu.dot_dimension_numbers<[1], [0], [0], [1], [0, 0, 1, 1], [], []>} : vector<8x32xf32>, vector<32x128xf32>, vector<8x128xf32> -> vector<8x128xf32>
    %c0_5 = arith.constant 0 : index
    %c0_6 = arith.constant 0 : index
    %7 = vector.load %arg5[%c0_5, %c0_6] : memref<1x128xf32, #tpu.memory_space<vmem>>, vector<1x128xf32>
    %8 = vector.broadcast %7 : vector<1x128xf32> to vector<8x128xf32>
    %9 = arith.addf %6, %8 : vector<8x128xf32>
    %10 = vector.shape_cast %9 : vector<8x128xf32> to vector<1x8x128xf32>
    %c0_7 = arith.constant 0 : index
    %c0_8 = arith.constant 0 : index
    %c0_9 = arith.constant 0 : index
    %11 = vector.load %arg9[%c0_7, %c0_8, %c0_9] : memref<1x8x128xf32, #tpu.memory_space<vmem>>, vector<1x8x128xf32>
    tpu.vector_store %arg9[%c0_7, %c0_8, %c0_9], %10 {strides = array<i32>} : memref<1x8x128xf32, #tpu.memory_space<vmem>>, vector<1x8x128xf32>,
    %c0_10 = arith.constant 0 : index
    %c0_11 = arith.constant 0 : index
    %12 = vector.load %arg4[%c0_10, %c0_11] : memref<32x128xf32, #tpu.memory_space<vmem>>, vector<32x128xf32>
    %c0_12 = arith.constant 0 : index
    %c0_13 = arith.constant 0 : index
    %13 = vector.load %arg7[%c0_12, %c0_13] : memref<1x32xf32, #tpu.memory_space<vmem>>, vector<1x32xf32>
    %c0_14 = arith.constant 0 : index
    %c0_15 = arith.constant 0 : index
    %14 = vector.load %arg8[%c0_14, %c0_15] : memref<1x32xf32, #tpu.memory_space<vmem>>, vector<1x32xf32>
    %c0_i32_16 = arith.constant 0 : i32
    %c8_i32 = arith.constant 8 : i32
    %15 = arith.muli %c0_i32_16, %c8_i32 : i32
    %16 = tpu.assume_multiple %15, 8 : i32
    %c0_17 = arith.constant 0 : index
    %17 = arith.index_cast %16 : i32 to index
    %c0_18 = arith.constant 0 : index
    %18 = vector.load %arg9[%c0_17, %17, %c0_18] : memref<1x8x128xf32, #tpu.memory_space<vmem>>, vector<1x8x128xf32>
    %19 = vector.extract_strided_slice %18 {offsets = [0, 0, 0], sizes = [1, 1, 128], strides = [1, 1, 1]} : vector<1x8x128xf32> to vector<1x1x128xf32>
    %20 = vector.shape_cast %19 : vector<1x1x128xf32> to vector<1x128xf32>
    %cst_19 = arith.constant dense<0.000000e+00> : vector<1x128xf32>
    %21 = tpu.matmul %13, %12, %cst_19 {dimension_numbers = #tpu.dot_dimension_numbers<[1], [0], [0], [1], [0, 0, 1, 1], [], []>} : vector<1x32xf32>, vector<32x128xf32>, vector<1x128xf32> -> vector<1x128xf32>
    %22 = arith.addf %20, %21 : vector<1x128xf32>
    %23 = vector.extract_strided_slice %22 {offsets = [0, 0], sizes = [1, 96], strides = [1, 1]} : vector<1x128xf32> to vector<1x96xf32>
    %24 = arith.negf %23 : vector<1x96xf32>
    %25 = math.exp %24 : vector<1x96xf32>
    %cst_20 = arith.constant 1.000000e+00 : f32
    %26 = vector.broadcast %cst_20 : f32 to vector<1x96xf32>
    %27 = arith.addf %26, %25 : vector<1x96xf32>
    %28 = arith.divf %26, %27 : vector<1x96xf32>
    %29 = vector.extract_strided_slice %28 {offsets = [0, 0], sizes = [1, 32], strides = [1, 1]} : vector<1x96xf32> to vector<1x32xf32>
    %30 = vector.extract_strided_slice %28 {offsets = [0, 32], sizes = [1, 32], strides = [1, 1]} : vector<1x96xf32> to vector<1x32xf32>
    %31 = vector.extract_strided_slice %28 {offsets = [0, 64], sizes = [1, 32], strides = [1, 1]} : vector<1x96xf32> to vector<1x32xf32>
    %32 = vector.extract_strided_slice %22 {offsets = [0, 96], sizes = [1, 32], strides = [1, 1]} : vector<1x128xf32> to vector<1x32xf32>
    %33 = math.tanh %32 : vector<1x32xf32>
    %34 = arith.mulf %30, %14 : vector<1x32xf32>
    %35 = arith.mulf %29, %33 : vector<1x32xf32>
    %36 = arith.addf %34, %35 : vector<1x32xf32>
    %37 = math.tanh %36 : vector<1x32xf32>
    %38 = arith.mulf %31, %37 : vector<1x32xf32>
    %39 = vector.extract_strided_slice %18 {offsets = [0, 1, 0], sizes = [1, 1, 128], strides = [1, 1, 1]} : vector<1x8x128xf32> to vector<1x1x128xf32>
    %40 = vector.shape_cast %39 : vector<1x1x128xf32> to vector<1x128xf32>
    %cst_21 = arith.constant dense<0.000000e+00> : vector<1x128xf32>
    %41 = tpu.matmul %38, %12, %cst_21 {dimension_numbers = #tpu.dot_dimension_numbers<[1], [0], [0], [1], [0, 0, 1, 1], [], []>} : vector<1x32xf32>, vector<32x128xf32>, vector<1x128xf32> -> vector<1x128xf32>
    %42 = arith.addf %40, %41 : vector<1x128xf32>
    %43 = vector.extract_strided_slice %42 {offsets = [0, 0], sizes = [1, 96], strides = [1, 1]} : vector<1x128xf32> to vector<1x96xf32>
    %44 = arith.negf %43 : vector<1x96xf32>
    %45 = math.exp %44 : vector<1x96xf32>
    %cst_22 = arith.constant 1.000000e+00 : f32
    %46 = vector.broadcast %cst_22 : f32 to vector<1x96xf32>
    %47 = arith.addf %46, %45 : vector<1x96xf32>
    %48 = arith.divf %46, %47 : vector<1x96xf32>
    %49 = vector.extract_strided_slice %48 {offsets = [0, 0], sizes = [1, 32], strides = [1, 1]} : vector<1x96xf32> to vector<1x32xf32>
    %50 = vector.extract_strided_slice %48 {offsets = [0, 32], sizes = [1, 32], strides = [1, 1]} : vector<1x96xf32> to vector<1x32xf32>
    %51 = vector.extract_strided_slice %48 {offsets = [0, 64], sizes = [1, 32], strides = [1, 1]} : vector<1x96xf32> to vector<1x32xf32>
    %52 = vector.extract_strided_slice %42 {offsets = [0, 96], sizes = [1, 32], strides = [1, 1]} : vector<1x128xf32> to vector<1x32xf32>
    %53 = math.tanh %52 : vector<1x32xf32>
    %54 = arith.mulf %50, %36 : vector<1x32xf32>
    %55 = arith.mulf %49, %53 : vector<1x32xf32>
    %56 = arith.addf %54, %55 : vector<1x32xf32>
    %57 = math.tanh %56 : vector<1x32xf32>
    %58 = arith.mulf %51, %57 : vector<1x32xf32>
    %59 = vector.extract_strided_slice %18 {offsets = [0, 2, 0], sizes = [1, 1, 128], strides = [1, 1, 1]} : vector<1x8x128xf32> to vector<1x1x128xf32>
    %60 = vector.shape_cast %59 : vector<1x1x128xf32> to vector<1x128xf32>
    %cst_23 = arith.constant dense<0.000000e+00> : vector<1x128xf32>
    %61 = tpu.matmul %58, %12, %cst_23 {dimension_numbers = #tpu.dot_dimension_numbers<[1], [0], [0], [1], [0, 0, 1, 1], [], []>} : vector<1x32xf32>, vector<32x128xf32>, vector<1x128xf32> -> vector<1x128xf32>
    %62 = arith.addf %60, %61 : vector<1x128xf32>
    %63 = vector.extract_strided_slice %62 {offsets = [0, 0], sizes = [1, 96], strides = [1, 1]} : vector<1x128xf32> to vector<1x96xf32>
    %64 = arith.negf %63 : vector<1x96xf32>
    %65 = math.exp %64 : vector<1x96xf32>
    %cst_24 = arith.constant 1.000000e+00 : f32
    %66 = vector.broadcast %cst_24 : f32 to vector<1x96xf32>
    %67 = arith.addf %66, %65 : vector<1x96xf32>
    %68 = arith.divf %66, %67 : vector<1x96xf32>
    %69 = vector.extract_strided_slice %68 {offsets = [0, 0], sizes = [1, 32], strides = [1, 1]} : vector<1x96xf32> to vector<1x32xf32>
    %70 = vector.extract_strided_slice %68 {offsets = [0, 32], sizes = [1, 32], strides = [1, 1]} : vector<1x96xf32> to vector<1x32xf32>
    %71 = vector.extract_strided_slice %68 {offsets = [0, 64], sizes = [1, 32], strides = [1, 1]} : vector<1x96xf32> to vector<1x32xf32>
    %72 = vector.extract_strided_slice %62 {offsets = [0, 96], sizes = [1, 32], strides = [1, 1]} : vector<1x128xf32> to vector<1x32xf32>
    %73 = math.tanh %72 : vector<1x32xf32>
    %74 = arith.mulf %70, %56 : vector<1x32xf32>
    %75 = arith.mulf %69, %73 : vector<1x32xf32>
    %76 = arith.addf %74, %75 : vector<1x32xf32>
    %77 = math.tanh %76 : vector<1x32xf32>
    %78 = arith.mulf %71, %77 : vector<1x32xf32>
    %79 = vector.extract_strided_slice %18 {offsets = [0, 3, 0], sizes = [1, 1, 128], strides = [1, 1, 1]} : vector<1x8x128xf32> to vector<1x1x128xf32>
    %80 = vector.shape_cast %79 : vector<1x1x128xf32> to vector<1x128xf32>
    %cst_25 = arith.constant dense<0.000000e+00> : vector<1x128xf32>
    %81 = tpu.matmul %78, %12, %cst_25 {dimension_numbers = #tpu.dot_dimension_numbers<[1], [0], [0], [1], [0, 0, 1, 1], [], []>} : vector<1x32xf32>, vector<32x128xf32>, vector<1x128xf32> -> vector<1x128xf32>
    %82 = arith.addf %80, %81 : vector<1x128xf32>
    %83 = vector.extract_strided_slice %82 {offsets = [0, 0], sizes = [1, 96], strides = [1, 1]} : vector<1x128xf32> to vector<1x96xf32>
    %84 = arith.negf %83 : vector<1x96xf32>
    %85 = math.exp %84 : vector<1x96xf32>
    %cst_26 = arith.constant 1.000000e+00 : f32
    %86 = vector.broadcast %cst_26 : f32 to vector<1x96xf32>
    %87 = arith.addf %86, %85 : vector<1x96xf32>
    %88 = arith.divf %86, %87 : vector<1x96xf32>
    %89 = vector.extract_strided_slice %88 {offsets = [0, 0], sizes = [1, 32], strides = [1, 1]} : vector<1x96xf32> to vector<1x32xf32>
    %90 = vector.extract_strided_slice %88 {offsets = [0, 32], sizes = [1, 32], strides = [1, 1]} : vector<1x96xf32> to vector<1x32xf32>
    %91 = vector.extract_strided_slice %88 {offsets = [0, 64], sizes = [1, 32], strides = [1, 1]} : vector<1x96xf32> to vector<1x32xf32>
    %92 = vector.extract_strided_slice %82 {offsets = [0, 96], sizes = [1, 32], strides = [1, 1]} : vector<1x128xf32> to vector<1x32xf32>
    %93 = math.tanh %92 : vector<1x32xf32>
    %94 = arith.mulf %90, %76 : vector<1x32xf32>
    %95 = arith.mulf %89, %93 : vector<1x32xf32>
    %96 = arith.addf %94, %95 : vector<1x32xf32>
    %97 = math.tanh %96 : vector<1x32xf32>
    %98 = arith.mulf %91, %97 : vector<1x32xf32>
    %99 = vector.extract_strided_slice %18 {offsets = [0, 4, 0], sizes = [1, 1, 128], strides = [1, 1, 1]} : vector<1x8x128xf32> to vector<1x1x128xf32>
    %100 = vector.shape_cast %99 : vector<1x1x128xf32> to vector<1x128xf32>
    %cst_27 = arith.constant dense<0.000000e+00> : vector<1x128xf32>
    %101 = tpu.matmul %98, %12, %cst_27 {dimension_numbers = #tpu.dot_dimension_numbers<[1], [0], [0], [1], [0, 0, 1, 1], [], []>} : vector<1x32xf32>, vector<32x128xf32>, vector<1x128xf32> -> vector<1x128xf32>
    %102 = arith.addf %100, %101 : vector<1x128xf32>
    %103 = vector.extract_strided_slice %102 {offsets = [0, 0], sizes = [1, 96], strides = [1, 1]} : vector<1x128xf32> to vector<1x96xf32>
    %104 = arith.negf %103 : vector<1x96xf32>
    %105 = math.exp %104 : vector<1x96xf32>
    %cst_28 = arith.constant 1.000000e+00 : f32
    %106 = vector.broadcast %cst_28 : f32 to vector<1x96xf32>
    %107 = arith.addf %106, %105 : vector<1x96xf32>
    %108 = arith.divf %106, %107 : vector<1x96xf32>
    %109 = vector.extract_strided_slice %108 {offsets = [0, 0], sizes = [1, 32], strides = [1, 1]} : vector<1x96xf32> to vector<1x32xf32>
    %110 = vector.extract_strided_slice %108 {offsets = [0, 32], sizes = [1, 32], strides = [1, 1]} : vector<1x96xf32> to vector<1x32xf32>
    %111 = vector.extract_strided_slice %108 {offsets = [0, 64], sizes = [1, 32], strides = [1, 1]} : vector<1x96xf32> to vector<1x32xf32>
    %112 = vector.extract_strided_slice %102 {offsets = [0, 96], sizes = [1, 32], strides = [1, 1]} : vector<1x128xf32> to vector<1x32xf32>
    %113 = math.tanh %112 : vector<1x32xf32>
    %114 = arith.mulf %110, %96 : vector<1x32xf32>
    %115 = arith.mulf %109, %113 : vector<1x32xf32>
    %116 = arith.addf %114, %115 : vector<1x32xf32>
    %117 = math.tanh %116 : vector<1x32xf32>
    %118 = arith.mulf %111, %117 : vector<1x32xf32>
    %119 = vector.extract_strided_slice %18 {offsets = [0, 5, 0], sizes = [1, 1, 128], strides = [1, 1, 1]} : vector<1x8x128xf32> to vector<1x1x128xf32>
    %120 = vector.shape_cast %119 : vector<1x1x128xf32> to vector<1x128xf32>
    %cst_29 = arith.constant dense<0.000000e+00> : vector<1x128xf32>
    %121 = tpu.matmul %118, %12, %cst_29 {dimension_numbers = #tpu.dot_dimension_numbers<[1], [0], [0], [1], [0, 0, 1, 1], [], []>} : vector<1x32xf32>, vector<32x128xf32>, vector<1x128xf32> -> vector<1x128xf32>
    %122 = arith.addf %120, %121 : vector<1x128xf32>
    %123 = vector.extract_strided_slice %122 {offsets = [0, 0], sizes = [1, 96], strides = [1, 1]} : vector<1x128xf32> to vector<1x96xf32>
    %124 = arith.negf %123 : vector<1x96xf32>
    %125 = math.exp %124 : vector<1x96xf32>
    %cst_30 = arith.constant 1.000000e+00 : f32
    %126 = vector.broadcast %cst_30 : f32 to vector<1x96xf32>
    %127 = arith.addf %126, %125 : vector<1x96xf32>
    %128 = arith.divf %126, %127 : vector<1x96xf32>
    %129 = vector.extract_strided_slice %128 {offsets = [0, 0], sizes = [1, 32], strides = [1, 1]} : vector<1x96xf32> to vector<1x32xf32>
    %130 = vector.extract_strided_slice %128 {offsets = [0, 32], sizes = [1, 32], strides = [1, 1]} : vector<1x96xf32> to vector<1x32xf32>
    %131 = vector.extract_strided_slice %128 {offsets = [0, 64], sizes = [1, 32], strides = [1, 1]} : vector<1x96xf32> to vector<1x32xf32>
    %132 = vector.extract_strided_slice %122 {offsets = [0, 96], sizes = [1, 32], strides = [1, 1]} : vector<1x128xf32> to vector<1x32xf32>
    %133 = math.tanh %132 : vector<1x32xf32>
    %134 = arith.mulf %130, %116 : vector<1x32xf32>
    %135 = arith.mulf %129, %133 : vector<1x32xf32>
    %136 = arith.addf %134, %135 : vector<1x32xf32>
    %137 = math.tanh %136 : vector<1x32xf32>
    %138 = arith.mulf %131, %137 : vector<1x32xf32>
    %139 = vector.extract_strided_slice %18 {offsets = [0, 6, 0], sizes = [1, 1, 128], strides = [1, 1, 1]} : vector<1x8x128xf32> to vector<1x1x128xf32>
    %140 = vector.shape_cast %139 : vector<1x1x128xf32> to vector<1x128xf32>
    %cst_31 = arith.constant dense<0.000000e+00> : vector<1x128xf32>
    %141 = tpu.matmul %138, %12, %cst_31 {dimension_numbers = #tpu.dot_dimension_numbers<[1], [0], [0], [1], [0, 0, 1, 1], [], []>} : vector<1x32xf32>, vector<32x128xf32>, vector<1x128xf32> -> vector<1x128xf32>
    %142 = arith.addf %140, %141 : vector<1x128xf32>
    %143 = vector.extract_strided_slice %142 {offsets = [0, 0], sizes = [1, 96], strides = [1, 1]} : vector<1x128xf32> to vector<1x96xf32>
    %144 = arith.negf %143 : vector<1x96xf32>
    %145 = math.exp %144 : vector<1x96xf32>
    %cst_32 = arith.constant 1.000000e+00 : f32
    %146 = vector.broadcast %cst_32 : f32 to vector<1x96xf32>
    %147 = arith.addf %146, %145 : vector<1x96xf32>
    %148 = arith.divf %146, %147 : vector<1x96xf32>
    %149 = vector.extract_strided_slice %148 {offsets = [0, 0], sizes = [1, 32], strides = [1, 1]} : vector<1x96xf32> to vector<1x32xf32>
    %150 = vector.extract_strided_slice %148 {offsets = [0, 32], sizes = [1, 32], strides = [1, 1]} : vector<1x96xf32> to vector<1x32xf32>
    %151 = vector.extract_strided_slice %148 {offsets = [0, 64], sizes = [1, 32], strides = [1, 1]} : vector<1x96xf32> to vector<1x32xf32>
    %152 = vector.extract_strided_slice %142 {offsets = [0, 96], sizes = [1, 32], strides = [1, 1]} : vector<1x128xf32> to vector<1x32xf32>
    %153 = math.tanh %152 : vector<1x32xf32>
    %154 = arith.mulf %150, %136 : vector<1x32xf32>
    %155 = arith.mulf %149, %153 : vector<1x32xf32>
    %156 = arith.addf %154, %155 : vector<1x32xf32>
    %157 = math.tanh %156 : vector<1x32xf32>
    %158 = arith.mulf %151, %157 : vector<1x32xf32>
    %159 = vector.extract_strided_slice %18 {offsets = [0, 7, 0], sizes = [1, 1, 128], strides = [1, 1, 1]} : vector<1x8x128xf32> to vector<1x1x128xf32>
    %160 = vector.shape_cast %159 : vector<1x1x128xf32> to vector<1x128xf32>
    %cst_33 = arith.constant dense<0.000000e+00> : vector<1x128xf32>
    %161 = tpu.matmul %158, %12, %cst_33 {dimension_numbers = #tpu.dot_dimension_numbers<[1], [0], [0], [1], [0, 0, 1, 1], [], []>} : vector<1x32xf32>, vector<32x128xf32>, vector<1x128xf32> -> vector<1x128xf32>
    %162 = arith.addf %160, %161 : vector<1x128xf32>
    %163 = vector.extract_strided_slice %162 {offsets = [0, 0], sizes = [1, 96], strides = [1, 1]} : vector<1x128xf32> to vector<1x96xf32>
    %164 = arith.negf %163 : vector<1x96xf32>
    %165 = math.exp %164 : vector<1x96xf32>
    %cst_34 = arith.constant 1.000000e+00 : f32
    %166 = vector.broadcast %cst_34 : f32 to vector<1x96xf32>
    %167 = arith.addf %166, %165 : vector<1x96xf32>
    %168 = arith.divf %166, %167 : vector<1x96xf32>
    %169 = vector.extract_strided_slice %168 {offsets = [0, 0], sizes = [1, 32], strides = [1, 1]} : vector<1x96xf32> to vector<1x32xf32>
    %170 = vector.extract_strided_slice %168 {offsets = [0, 32], sizes = [1, 32], strides = [1, 1]} : vector<1x96xf32> to vector<1x32xf32>
    %171 = vector.extract_strided_slice %168 {offsets = [0, 64], sizes = [1, 32], strides = [1, 1]} : vector<1x96xf32> to vector<1x32xf32>
    %172 = vector.extract_strided_slice %162 {offsets = [0, 96], sizes = [1, 32], strides = [1, 1]} : vector<1x128xf32> to vector<1x32xf32>
    %173 = math.tanh %172 : vector<1x32xf32>
    %174 = arith.mulf %170, %156 : vector<1x32xf32>
    %175 = arith.mulf %169, %173 : vector<1x32xf32>
    %176 = arith.addf %174, %175 : vector<1x32xf32>
    %177 = math.tanh %176 : vector<1x32xf32>
    %178 = arith.mulf %171, %177 : vector<1x32xf32>
    %179 = vector.shape_cast %38 : vector<1x32xf32> to vector<1x1x32xf32>
    %180 = vector.shape_cast %58 : vector<1x32xf32> to vector<1x1x32xf32>
    %181 = vector.shape_cast %78 : vector<1x32xf32> to vector<1x1x32xf32>
    %182 = vector.shape_cast %98 : vector<1x32xf32> to vector<1x1x32xf32>
    %183 = vector.shape_cast %118 : vector<1x32xf32> to vector<1x1x32xf32>
    %184 = vector.shape_cast %138 : vector<1x32xf32> to vector<1x1x32xf32>
    %185 = vector.shape_cast %158 : vector<1x32xf32> to vector<1x1x32xf32>
    %186 = vector.shape_cast %178 : vector<1x32xf32> to vector<1x1x32xf32>
    %187 = tpu.concatenate %179, %180, %181, %182, %183, %184, %185, %186 in 1 : vector<1x1x32xf32>, vector<1x1x32xf32>, vector<1x1x32xf32>, vector<1x1x32xf32>, vector<1x1x32xf32>, vector<1x1x32xf32>, vector<1x1x32xf32>, vector<1x1x32xf32> -> vector<1x8x32xf32>
    %c0_35 = arith.constant 0 : index
    %188 = arith.index_cast %16 : i32 to index
    %c0_36 = arith.constant 0 : index
    %189 = vector.load %arg6[%c0_35, %188, %c0_36] : memref<1x8x32xf32, #tpu.memory_space<vmem>>, vector<1x8x32xf32>
    tpu.vector_store %arg6[%c0_35, %188, %c0_36], %187 {strides = array<i32>} : memref<1x8x32xf32, #tpu.memory_space<vmem>>, vector<1x8x32xf32>,
    %c1_i32 = arith.constant 1 : i32
    %c0_37 = arith.constant 0 : index
    %c0_38 = arith.constant 0 : index
    %190 = vector.load %arg7[%c0_37, %c0_38] : memref<1x32xf32, #tpu.memory_space<vmem>>, vector<1x32xf32>
    tpu.vector_store %arg7[%c0_37, %c0_38], %178 {strides = array<i32>} : memref<1x32xf32, #tpu.memory_space<vmem>>, vector<1x32xf32>,
    %c0_39 = arith.constant 0 : index
    %c0_40 = arith.constant 0 : index
    %191 = vector.load %arg8[%c0_39, %c0_40] : memref<1x32xf32, #tpu.memory_space<vmem>>, vector<1x32xf32>
    tpu.vector_store %arg8[%c0_39, %c0_40], %176 {strides = array<i32>} : memref<1x32xf32, #tpu.memory_space<vmem>>, vector<1x32xf32>,
    return
  }
  func.func @transform_0(%arg0: i32, %arg1: i32) -> (i32, i32, i32) {
    %c0_i32 = arith.constant 0 : i32
    %c0_i32_0 = arith.constant 0 : i32
    return %arg0, %arg1, %c0_i32 : i32, i32, i32
  }
  func.func @transform_1(%arg0: i32, %arg1: i32) -> (i32, i32) {
    %c0_i32 = arith.constant 0 : i32
    %c0_i32_0 = arith.constant 0 : i32
    %c0_i32_1 = arith.constant 0 : i32
    return %c0_i32, %c0_i32_0 : i32, i32
  }
  func.func @transform_2(%arg0: i32, %arg1: i32) -> (i32, i32) {
    %c0_i32 = arith.constant 0 : i32
    %c0_i32_0 = arith.constant 0 : i32
    %c0_i32_1 = arith.constant 0 : i32
    return %c0_i32, %c0_i32_0 : i32, i32
  }
  func.func @transform_3(%arg0: i32, %arg1: i32) -> (i32, i32) {
    %c0_i32 = arith.constant 0 : i32
    %c0_i32_0 = arith.constant 0 : i32
    %c0_i32_1 = arith.constant 0 : i32
    return %c0_i32, %c0_i32_0 : i32, i32
  }
  func.func @transform_4(%arg0: i32, %arg1: i32) -> (i32, i32, i32) {
    %c0_i32 = arith.constant 0 : i32
    %c0_i32_0 = arith.constant 0 : i32
    return %arg0, %arg1, %c0_i32 : i32, i32, i32
  }
}

module attributes {stable_mosaic.version = 11 : i64} {
  func.func @_lstm_fused_kernel(%arg0: i32, %arg1: i32, %arg2: memref<1x8x16xf32, #tpu.memory_space<vmem>>, %arg3: memref<16x128xf32, #tpu.memory_space<vmem>>, %arg4: memref<32x128xf32, #tpu.memory_space<vmem>>, %arg5: memref<1x128xf32, #tpu.memory_space<vmem>>, %arg6: memref<1x8x32xf32, #tpu.memory_space<vmem>>, %arg7: memref<1x32xf32, #tpu.memory_space<vmem>>, %arg8: memref<1x32xf32, #tpu.memory_space<vmem>>, %arg9: memref<1x8x128xf32, #tpu.memory_space<vmem>>) attributes {dimension_semantics = [#tpu.dimension_semantics<parallel>, #tpu.dimension_semantics<arbitrary>], iteration_bounds = array<i64: 2, 1>, scalar_prefetch = 0 : i64, scratch_operands = 3 : i64, tpu.core_type = #tpu.core_type<tc>, window_params = [{transform_indices = @transform_0, window_bounds = array<i64: 1, 8, 16>}, {pipeline_mode = #tpu.pipeline_mode<synchronous>, transform_indices = @transform_1, window_bounds = array<i64: 16, 128>}, {pipeline_mode = #tpu.pipeline_mode<synchronous>, transform_indices = @transform_2, window_bounds = array<i64: 32, 128>}, {pipeline_mode = #tpu.pipeline_mode<synchronous>, transform_indices = @transform_3, window_bounds = array<i64: 1, 128>}, {transform_indices = @transform_4, window_bounds = array<i64: 1, 8, 32>}]} {
    %c0_i32 = arith.constant 0 : i32
    %0 = arith.cmpi eq, %arg1, %c0_i32 : i32
    %1 = arith.extui %0 : i1 to i32
    %c0_i32_0 = arith.constant 0 : i32
    %2 = arith.cmpi ne, %1, %c0_i32_0 : i32
    scf.if %2 {
      %cst_41 = arith.constant 0.000000e+00 : f32
      %192 = vector.broadcast %cst_41 : f32 to vector<1x32xf32>
      %c0_42 = arith.constant 0 : index
      %c0_43 = arith.constant 0 : index
      %193 = vector.load %arg7[%c0_42, %c0_43] : memref<1x32xf32, #tpu.memory_space<vmem>>, vector<1x32xf32>
      tpu.vector_store %arg7[%c0_42, %c0_43], %192 {strides = array<i32>} : memref<1x32xf32, #tpu.memory_space<vmem>>, vector<1x32xf32>,
      %cst_44 = arith.constant 0.000000e+00 : f32
      %194 = vector.broadcast %cst_44 : f32 to vector<1x32xf32>
      %c0_45 = arith.constant 0 : index
      %c0_46 = arith.constant 0 : index
      %195 = vector.load %arg8[%c0_45, %c0_46] : memref<1x32xf32, #tpu.memory_space<vmem>>, vector<1x32xf32>
      tpu.vector_store %arg8[%c0_45, %c0_46], %194 {strides = array<i32>} : memref<1x32xf32, #tpu.memory_space<vmem>>, vector<1x32xf32>,
    } else {
    }
    %c0 = arith.constant 0 : index
    %c0_1 = arith.constant 0 : index
    %c0_2 = arith.constant 0 : index
    %3 = vector.load %arg2[%c0, %c0_1, %c0_2] : memref<1x8x16xf32, #tpu.memory_space<vmem>>, vector<1x8x16xf32>
    %4 = vector.shape_cast %3 : vector<1x8x16xf32> to vector<8x16xf32>
    %c0_3 = arith.constant 0 : index
    %c0_4 = arith.constant 0 : index
    %5 = vector.load %arg3[%c0_3, %c0_4] : memref<16x128xf32, #tpu.memory_space<vmem>>, vector<16x128xf32>
    %cst = arith.constant dense<0.000000e+00> : vector<8x128xf32>
    %6 = tpu.matmul %4, %5, %cst {dimension_numbers = #tpu.dot_dimension_numbers<[1], [0], [0], [1], [0, 0, 1, 1], [], []>} : vector<8x16xf32>, vector<16x128xf32>, vector<8x128xf32> -> vector<8x128xf32>
    %c0_5 = arith.constant 0 : index
    %c0_6 = arith.constant 0 : index
    %7 = vector.load %arg5[%c0_5, %c0_6] : memref<1x128xf32, #tpu.memory_space<vmem>>, vector<1x128xf32>
    %8 = vector.broadcast %7 : vector<1x128xf32> to vector<8x128xf32>
    %9 = arith.addf %6, %8 : vector<8x128xf32>
    %10 = vector.shape_cast %9 : vector<8x128xf32> to vector<1x8x128xf32>
    %c0_7 = arith.constant 0 : index
    %c0_8 = arith.constant 0 : index
    %c0_9 = arith.constant 0 : index
    %11 = vector.load %arg9[%c0_7, %c0_8, %c0_9] : memref<1x8x128xf32, #tpu.memory_space<vmem>>, vector<1x8x128xf32>
    tpu.vector_store %arg9[%c0_7, %c0_8, %c0_9], %10 {strides = array<i32>} : memref<1x8x128xf32, #tpu.memory_space<vmem>>, vector<1x8x128xf32>,
    %c0_10 = arith.constant 0 : index
    %c0_11 = arith.constant 0 : index
    %12 = vector.load %arg4[%c0_10, %c0_11] : memref<32x128xf32, #tpu.memory_space<vmem>>, vector<32x128xf32>
    %c0_12 = arith.constant 0 : index
    %c0_13 = arith.constant 0 : index
    %13 = vector.load %arg7[%c0_12, %c0_13] : memref<1x32xf32, #tpu.memory_space<vmem>>, vector<1x32xf32>
    %c0_14 = arith.constant 0 : index
    %c0_15 = arith.constant 0 : index
    %14 = vector.load %arg8[%c0_14, %c0_15] : memref<1x32xf32, #tpu.memory_space<vmem>>, vector<1x32xf32>
    %c0_i32_16 = arith.constant 0 : i32
    %c8_i32 = arith.constant 8 : i32
    %15 = arith.muli %c0_i32_16, %c8_i32 : i32
    %16 = tpu.assume_multiple %15, 8 : i32
    %c0_17 = arith.constant 0 : index
    %17 = arith.index_cast %16 : i32 to index
    %c0_18 = arith.constant 0 : index
    %18 = vector.load %arg9[%c0_17, %17, %c0_18] : memref<1x8x128xf32, #tpu.memory_space<vmem>>, vector<1x8x128xf32>
    %19 = vector.extract_strided_slice %18 {offsets = [0, 0, 0], sizes = [1, 1, 128], strides = [1, 1, 1]} : vector<1x8x128xf32> to vector<1x1x128xf32>
    %20 = vector.shape_cast %19 : vector<1x1x128xf32> to vector<1x128xf32>
    %cst_19 = arith.constant dense<0.000000e+00> : vector<1x128xf32>
    %21 = tpu.matmul %13, %12, %cst_19 {dimension_numbers = #tpu.dot_dimension_numbers<[1], [0], [0], [1], [0, 0, 1, 1], [], []>} : vector<1x32xf32>, vector<32x128xf32>, vector<1x128xf32> -> vector<1x128xf32>
    %22 = arith.addf %20, %21 : vector<1x128xf32>
    %23 = vector.extract_strided_slice %22 {offsets = [0, 0], sizes = [1, 96], strides = [1, 1]} : vector<1x128xf32> to vector<1x96xf32>
    %24 = arith.negf %23 : vector<1x96xf32>
    %25 = math.exp %24 : vector<1x96xf32>
    %cst_20 = arith.constant 1.000000e+00 : f32
    %26 = vector.broadcast %cst_20 : f32 to vector<1x96xf32>
    %27 = arith.addf %26, %25 : vector<1x96xf32>
    %28 = arith.divf %26, %27 : vector<1x96xf32>
    %29 = vector.extract_strided_slice %28 {offsets = [0, 0], sizes = [1, 32], strides = [1, 1]} : vector<1x96xf32> to vector<1x32xf32>
    %30 = vector.extract_strided_slice %28 {offsets = [0, 32], sizes = [1, 32], strides = [1, 1]} : vector<1x96xf32> to vector<1x32xf32>
    %31 = vector.extract_strided_slice %28 {offsets = [0, 64], sizes = [1, 32], strides = [1, 1]} : vector<1x96xf32> to vector<1x32xf32>
    %32 = vector.extract_strided_slice %22 {offsets = [0, 96], sizes = [1, 32], strides = [1, 1]} : vector<1x128xf32> to vector<1x32xf32>
    %33 = math.tanh %32 : vector<1x32xf32>
    %34 = arith.mulf %30, %14 : vector<1x32xf32>
    %35 = arith.mulf %29, %33 : vector<1x32xf32>
    %36 = arith.addf %34, %35 : vector<1x32xf32>
    %37 = math.tanh %36 : vector<1x32xf32>
    %38 = arith.mulf %31, %37 : vector<1x32xf32>
    %39 = vector.extract_strided_slice %18 {offsets = [0, 1, 0], sizes = [1, 1, 128], strides = [1, 1, 1]} : vector<1x8x128xf32> to vector<1x1x128xf32>
    %40 = vector.shape_cast %39 : vector<1x1x128xf32> to vector<1x128xf32>
    %cst_21 = arith.constant dense<0.000000e+00> : vector<1x128xf32>
    %41 = tpu.matmul %38, %12, %cst_21 {dimension_numbers = #tpu.dot_dimension_numbers<[1], [0], [0], [1], [0, 0, 1, 1], [], []>} : vector<1x32xf32>, vector<32x128xf32>, vector<1x128xf32> -> vector<1x128xf32>
    %42 = arith.addf %40, %41 : vector<1x128xf32>
    %43 = vector.extract_strided_slice %42 {offsets = [0, 0], sizes = [1, 96], strides = [1, 1]} : vector<1x128xf32> to vector<1x96xf32>
    %44 = arith.negf %43 : vector<1x96xf32>
    %45 = math.exp %44 : vector<1x96xf32>
    %cst_22 = arith.constant 1.000000e+00 : f32
    %46 = vector.broadcast %cst_22 : f32 to vector<1x96xf32>
    %47 = arith.addf %46, %45 : vector<1x96xf32>
    %48 = arith.divf %46, %47 : vector<1x96xf32>
    %49 = vector.extract_strided_slice %48 {offsets = [0, 0], sizes = [1, 32], strides = [1, 1]} : vector<1x96xf32> to vector<1x32xf32>
    %50 = vector.extract_strided_slice %48 {offsets = [0, 32], sizes = [1, 32], strides = [1, 1]} : vector<1x96xf32> to vector<1x32xf32>
    %51 = vector.extract_strided_slice %48 {offsets = [0, 64], sizes = [1, 32], strides = [1, 1]} : vector<1x96xf32> to vector<1x32xf32>
    %52 = vector.extract_strided_slice %42 {offsets = [0, 96], sizes = [1, 32], strides = [1, 1]} : vector<1x128xf32> to vector<1x32xf32>
    %53 = math.tanh %52 : vector<1x32xf32>
    %54 = arith.mulf %50, %36 : vector<1x32xf32>
    %55 = arith.mulf %49, %53 : vector<1x32xf32>
    %56 = arith.addf %54, %55 : vector<1x32xf32>
    %57 = math.tanh %56 : vector<1x32xf32>
    %58 = arith.mulf %51, %57 : vector<1x32xf32>
    %59 = vector.extract_strided_slice %18 {offsets = [0, 2, 0], sizes = [1, 1, 128], strides = [1, 1, 1]} : vector<1x8x128xf32> to vector<1x1x128xf32>
    %60 = vector.shape_cast %59 : vector<1x1x128xf32> to vector<1x128xf32>
    %cst_23 = arith.constant dense<0.000000e+00> : vector<1x128xf32>
    %61 = tpu.matmul %58, %12, %cst_23 {dimension_numbers = #tpu.dot_dimension_numbers<[1], [0], [0], [1], [0, 0, 1, 1], [], []>} : vector<1x32xf32>, vector<32x128xf32>, vector<1x128xf32> -> vector<1x128xf32>
    %62 = arith.addf %60, %61 : vector<1x128xf32>
    %63 = vector.extract_strided_slice %62 {offsets = [0, 0], sizes = [1, 96], strides = [1, 1]} : vector<1x128xf32> to vector<1x96xf32>
    %64 = arith.negf %63 : vector<1x96xf32>
    %65 = math.exp %64 : vector<1x96xf32>
    %cst_24 = arith.constant 1.000000e+00 : f32
    %66 = vector.broadcast %cst_24 : f32 to vector<1x96xf32>
    %67 = arith.addf %66, %65 : vector<1x96xf32>
    %68 = arith.divf %66, %67 : vector<1x96xf32>
    %69 = vector.extract_strided_slice %68 {offsets = [0, 0], sizes = [1, 32], strides = [1, 1]} : vector<1x96xf32> to vector<1x32xf32>
    %70 = vector.extract_strided_slice %68 {offsets = [0, 32], sizes = [1, 32], strides = [1, 1]} : vector<1x96xf32> to vector<1x32xf32>
    %71 = vector.extract_strided_slice %68 {offsets = [0, 64], sizes = [1, 32], strides = [1, 1]} : vector<1x96xf32> to vector<1x32xf32>
    %72 = vector.extract_strided_slice %62 {offsets = [0, 96], sizes = [1, 32], strides = [1, 1]} : vector<1x128xf32> to vector<1x32xf32>
    %73 = math.tanh %72 : vector<1x32xf32>
    %74 = arith.mulf %70, %56 : vector<1x32xf32>
    %75 = arith.mulf %69, %73 : vector<1x32xf32>
    %76 = arith.addf %74, %75 : vector<1x32xf32>
    %77 = math.tanh %76 : vector<1x32xf32>
    %78 = arith.mulf %71, %77 : vector<1x32xf32>
    %79 = vector.extract_strided_slice %18 {offsets = [0, 3, 0], sizes = [1, 1, 128], strides = [1, 1, 1]} : vector<1x8x128xf32> to vector<1x1x128xf32>
    %80 = vector.shape_cast %79 : vector<1x1x128xf32> to vector<1x128xf32>
    %cst_25 = arith.constant dense<0.000000e+00> : vector<1x128xf32>
    %81 = tpu.matmul %78, %12, %cst_25 {dimension_numbers = #tpu.dot_dimension_numbers<[1], [0], [0], [1], [0, 0, 1, 1], [], []>} : vector<1x32xf32>, vector<32x128xf32>, vector<1x128xf32> -> vector<1x128xf32>
    %82 = arith.addf %80, %81 : vector<1x128xf32>
    %83 = vector.extract_strided_slice %82 {offsets = [0, 0], sizes = [1, 96], strides = [1, 1]} : vector<1x128xf32> to vector<1x96xf32>
    %84 = arith.negf %83 : vector<1x96xf32>
    %85 = math.exp %84 : vector<1x96xf32>
    %cst_26 = arith.constant 1.000000e+00 : f32
    %86 = vector.broadcast %cst_26 : f32 to vector<1x96xf32>
    %87 = arith.addf %86, %85 : vector<1x96xf32>
    %88 = arith.divf %86, %87 : vector<1x96xf32>
    %89 = vector.extract_strided_slice %88 {offsets = [0, 0], sizes = [1, 32], strides = [1, 1]} : vector<1x96xf32> to vector<1x32xf32>
    %90 = vector.extract_strided_slice %88 {offsets = [0, 32], sizes = [1, 32], strides = [1, 1]} : vector<1x96xf32> to vector<1x32xf32>
    %91 = vector.extract_strided_slice %88 {offsets = [0, 64], sizes = [1, 32], strides = [1, 1]} : vector<1x96xf32> to vector<1x32xf32>
    %92 = vector.extract_strided_slice %82 {offsets = [0, 96], sizes = [1, 32], strides = [1, 1]} : vector<1x128xf32> to vector<1x32xf32>
    %93 = math.tanh %92 : vector<1x32xf32>
    %94 = arith.mulf %90, %76 : vector<1x32xf32>
    %95 = arith.mulf %89, %93 : vector<1x32xf32>
    %96 = arith.addf %94, %95 : vector<1x32xf32>
    %97 = math.tanh %96 : vector<1x32xf32>
    %98 = arith.mulf %91, %97 : vector<1x32xf32>
    %99 = vector.extract_strided_slice %18 {offsets = [0, 4, 0], sizes = [1, 1, 128], strides = [1, 1, 1]} : vector<1x8x128xf32> to vector<1x1x128xf32>
    %100 = vector.shape_cast %99 : vector<1x1x128xf32> to vector<1x128xf32>
    %cst_27 = arith.constant dense<0.000000e+00> : vector<1x128xf32>
    %101 = tpu.matmul %98, %12, %cst_27 {dimension_numbers = #tpu.dot_dimension_numbers<[1], [0], [0], [1], [0, 0, 1, 1], [], []>} : vector<1x32xf32>, vector<32x128xf32>, vector<1x128xf32> -> vector<1x128xf32>
    %102 = arith.addf %100, %101 : vector<1x128xf32>
    %103 = vector.extract_strided_slice %102 {offsets = [0, 0], sizes = [1, 96], strides = [1, 1]} : vector<1x128xf32> to vector<1x96xf32>
    %104 = arith.negf %103 : vector<1x96xf32>
    %105 = math.exp %104 : vector<1x96xf32>
    %cst_28 = arith.constant 1.000000e+00 : f32
    %106 = vector.broadcast %cst_28 : f32 to vector<1x96xf32>
    %107 = arith.addf %106, %105 : vector<1x96xf32>
    %108 = arith.divf %106, %107 : vector<1x96xf32>
    %109 = vector.extract_strided_slice %108 {offsets = [0, 0], sizes = [1, 32], strides = [1, 1]} : vector<1x96xf32> to vector<1x32xf32>
    %110 = vector.extract_strided_slice %108 {offsets = [0, 32], sizes = [1, 32], strides = [1, 1]} : vector<1x96xf32> to vector<1x32xf32>
    %111 = vector.extract_strided_slice %108 {offsets = [0, 64], sizes = [1, 32], strides = [1, 1]} : vector<1x96xf32> to vector<1x32xf32>
    %112 = vector.extract_strided_slice %102 {offsets = [0, 96], sizes = [1, 32], strides = [1, 1]} : vector<1x128xf32> to vector<1x32xf32>
    %113 = math.tanh %112 : vector<1x32xf32>
    %114 = arith.mulf %110, %96 : vector<1x32xf32>
    %115 = arith.mulf %109, %113 : vector<1x32xf32>
    %116 = arith.addf %114, %115 : vector<1x32xf32>
    %117 = math.tanh %116 : vector<1x32xf32>
    %118 = arith.mulf %111, %117 : vector<1x32xf32>
    %119 = vector.extract_strided_slice %18 {offsets = [0, 5, 0], sizes = [1, 1, 128], strides = [1, 1, 1]} : vector<1x8x128xf32> to vector<1x1x128xf32>
    %120 = vector.shape_cast %119 : vector<1x1x128xf32> to vector<1x128xf32>
    %cst_29 = arith.constant dense<0.000000e+00> : vector<1x128xf32>
    %121 = tpu.matmul %118, %12, %cst_29 {dimension_numbers = #tpu.dot_dimension_numbers<[1], [0], [0], [1], [0, 0, 1, 1], [], []>} : vector<1x32xf32>, vector<32x128xf32>, vector<1x128xf32> -> vector<1x128xf32>
    %122 = arith.addf %120, %121 : vector<1x128xf32>
    %123 = vector.extract_strided_slice %122 {offsets = [0, 0], sizes = [1, 96], strides = [1, 1]} : vector<1x128xf32> to vector<1x96xf32>
    %124 = arith.negf %123 : vector<1x96xf32>
    %125 = math.exp %124 : vector<1x96xf32>
    %cst_30 = arith.constant 1.000000e+00 : f32
    %126 = vector.broadcast %cst_30 : f32 to vector<1x96xf32>
    %127 = arith.addf %126, %125 : vector<1x96xf32>
    %128 = arith.divf %126, %127 : vector<1x96xf32>
    %129 = vector.extract_strided_slice %128 {offsets = [0, 0], sizes = [1, 32], strides = [1, 1]} : vector<1x96xf32> to vector<1x32xf32>
    %130 = vector.extract_strided_slice %128 {offsets = [0, 32], sizes = [1, 32], strides = [1, 1]} : vector<1x96xf32> to vector<1x32xf32>
    %131 = vector.extract_strided_slice %128 {offsets = [0, 64], sizes = [1, 32], strides = [1, 1]} : vector<1x96xf32> to vector<1x32xf32>
    %132 = vector.extract_strided_slice %122 {offsets = [0, 96], sizes = [1, 32], strides = [1, 1]} : vector<1x128xf32> to vector<1x32xf32>
    %133 = math.tanh %132 : vector<1x32xf32>
    %134 = arith.mulf %130, %116 : vector<1x32xf32>
    %135 = arith.mulf %129, %133 : vector<1x32xf32>
    %136 = arith.addf %134, %135 : vector<1x32xf32>
    %137 = math.tanh %136 : vector<1x32xf32>
    %138 = arith.mulf %131, %137 : vector<1x32xf32>
    %139 = vector.extract_strided_slice %18 {offsets = [0, 6, 0], sizes = [1, 1, 128], strides = [1, 1, 1]} : vector<1x8x128xf32> to vector<1x1x128xf32>
    %140 = vector.shape_cast %139 : vector<1x1x128xf32> to vector<1x128xf32>
    %cst_31 = arith.constant dense<0.000000e+00> : vector<1x128xf32>
    %141 = tpu.matmul %138, %12, %cst_31 {dimension_numbers = #tpu.dot_dimension_numbers<[1], [0], [0], [1], [0, 0, 1, 1], [], []>} : vector<1x32xf32>, vector<32x128xf32>, vector<1x128xf32> -> vector<1x128xf32>
    %142 = arith.addf %140, %141 : vector<1x128xf32>
    %143 = vector.extract_strided_slice %142 {offsets = [0, 0], sizes = [1, 96], strides = [1, 1]} : vector<1x128xf32> to vector<1x96xf32>
    %144 = arith.negf %143 : vector<1x96xf32>
    %145 = math.exp %144 : vector<1x96xf32>
    %cst_32 = arith.constant 1.000000e+00 : f32
    %146 = vector.broadcast %cst_32 : f32 to vector<1x96xf32>
    %147 = arith.addf %146, %145 : vector<1x96xf32>
    %148 = arith.divf %146, %147 : vector<1x96xf32>
    %149 = vector.extract_strided_slice %148 {offsets = [0, 0], sizes = [1, 32], strides = [1, 1]} : vector<1x96xf32> to vector<1x32xf32>
    %150 = vector.extract_strided_slice %148 {offsets = [0, 32], sizes = [1, 32], strides = [1, 1]} : vector<1x96xf32> to vector<1x32xf32>
    %151 = vector.extract_strided_slice %148 {offsets = [0, 64], sizes = [1, 32], strides = [1, 1]} : vector<1x96xf32> to vector<1x32xf32>
    %152 = vector.extract_strided_slice %142 {offsets = [0, 96], sizes = [1, 32], strides = [1, 1]} : vector<1x128xf32> to vector<1x32xf32>
    %153 = math.tanh %152 : vector<1x32xf32>
    %154 = arith.mulf %150, %136 : vector<1x32xf32>
    %155 = arith.mulf %149, %153 : vector<1x32xf32>
    %156 = arith.addf %154, %155 : vector<1x32xf32>
    %157 = math.tanh %156 : vector<1x32xf32>
    %158 = arith.mulf %151, %157 : vector<1x32xf32>
    %159 = vector.extract_strided_slice %18 {offsets = [0, 7, 0], sizes = [1, 1, 128], strides = [1, 1, 1]} : vector<1x8x128xf32> to vector<1x1x128xf32>
    %160 = vector.shape_cast %159 : vector<1x1x128xf32> to vector<1x128xf32>
    %cst_33 = arith.constant dense<0.000000e+00> : vector<1x128xf32>
    %161 = tpu.matmul %158, %12, %cst_33 {dimension_numbers = #tpu.dot_dimension_numbers<[1], [0], [0], [1], [0, 0, 1, 1], [], []>} : vector<1x32xf32>, vector<32x128xf32>, vector<1x128xf32> -> vector<1x128xf32>
    %162 = arith.addf %160, %161 : vector<1x128xf32>
    %163 = vector.extract_strided_slice %162 {offsets = [0, 0], sizes = [1, 96], strides = [1, 1]} : vector<1x128xf32> to vector<1x96xf32>
    %164 = arith.negf %163 : vector<1x96xf32>
    %165 = math.exp %164 : vector<1x96xf32>
    %cst_34 = arith.constant 1.000000e+00 : f32
    %166 = vector.broadcast %cst_34 : f32 to vector<1x96xf32>
    %167 = arith.addf %166, %165 : vector<1x96xf32>
    %168 = arith.divf %166, %167 : vector<1x96xf32>
    %169 = vector.extract_strided_slice %168 {offsets = [0, 0], sizes = [1, 32], strides = [1, 1]} : vector<1x96xf32> to vector<1x32xf32>
    %170 = vector.extract_strided_slice %168 {offsets = [0, 32], sizes = [1, 32], strides = [1, 1]} : vector<1x96xf32> to vector<1x32xf32>
    %171 = vector.extract_strided_slice %168 {offsets = [0, 64], sizes = [1, 32], strides = [1, 1]} : vector<1x96xf32> to vector<1x32xf32>
    %172 = vector.extract_strided_slice %162 {offsets = [0, 96], sizes = [1, 32], strides = [1, 1]} : vector<1x128xf32> to vector<1x32xf32>
    %173 = math.tanh %172 : vector<1x32xf32>
    %174 = arith.mulf %170, %156 : vector<1x32xf32>
    %175 = arith.mulf %169, %173 : vector<1x32xf32>
    %176 = arith.addf %174, %175 : vector<1x32xf32>
    %177 = math.tanh %176 : vector<1x32xf32>
    %178 = arith.mulf %171, %177 : vector<1x32xf32>
    %179 = vector.shape_cast %38 : vector<1x32xf32> to vector<1x1x32xf32>
    %180 = vector.shape_cast %58 : vector<1x32xf32> to vector<1x1x32xf32>
    %181 = vector.shape_cast %78 : vector<1x32xf32> to vector<1x1x32xf32>
    %182 = vector.shape_cast %98 : vector<1x32xf32> to vector<1x1x32xf32>
    %183 = vector.shape_cast %118 : vector<1x32xf32> to vector<1x1x32xf32>
    %184 = vector.shape_cast %138 : vector<1x32xf32> to vector<1x1x32xf32>
    %185 = vector.shape_cast %158 : vector<1x32xf32> to vector<1x1x32xf32>
    %186 = vector.shape_cast %178 : vector<1x32xf32> to vector<1x1x32xf32>
    %187 = tpu.concatenate %179, %180, %181, %182, %183, %184, %185, %186 in 1 : vector<1x1x32xf32>, vector<1x1x32xf32>, vector<1x1x32xf32>, vector<1x1x32xf32>, vector<1x1x32xf32>, vector<1x1x32xf32>, vector<1x1x32xf32>, vector<1x1x32xf32> -> vector<1x8x32xf32>
    %c0_35 = arith.constant 0 : index
    %188 = arith.index_cast %16 : i32 to index
    %c0_36 = arith.constant 0 : index
    %189 = vector.load %arg6[%c0_35, %188, %c0_36] : memref<1x8x32xf32, #tpu.memory_space<vmem>>, vector<1x8x32xf32>
    tpu.vector_store %arg6[%c0_35, %188, %c0_36], %187 {strides = array<i32>} : memref<1x8x32xf32, #tpu.memory_space<vmem>>, vector<1x8x32xf32>,
    %c1_i32 = arith.constant 1 : i32
    %c0_37 = arith.constant 0 : index
    %c0_38 = arith.constant 0 : index
    %190 = vector.load %arg7[%c0_37, %c0_38] : memref<1x32xf32, #tpu.memory_space<vmem>>, vector<1x32xf32>
    tpu.vector_store %arg7[%c0_37, %c0_38], %178 {strides = array<i32>} : memref<1x32xf32, #tpu.memory_space<vmem>>, vector<1x32xf32>,
    %c0_39 = arith.constant 0 : index
    %c0_40 = arith.constant 0 : index
    %191 = vector.load %arg8[%c0_39, %c0_40] : memref<1x32xf32, #tpu.memory_space<vmem>>, vector<1x32xf32>
    tpu.vector_store %arg8[%c0_39, %c0_40], %176 {strides = array<i32>} : memref<1x32xf32, #tpu.memory_space<vmem>>, vector<1x32xf32>,
    return
  }
  func.func @transform_0(%arg0: i32, %arg1: i32) -> (i32, i32, i32) {
    %c0_i32 = arith.constant 0 : i32
    %c0_i32_0 = arith.constant 0 : i32
    return %arg0, %arg1, %c0_i32 : i32, i32, i32
  }
  func.func @transform_1(%arg0: i32, %arg1: i32) -> (i32, i32) {
    %c0_i32 = arith.constant 0 : i32
    %c0_i32_0 = arith.constant 0 : i32
    %c0_i32_1 = arith.constant 0 : i32
    return %c0_i32, %c0_i32_0 : i32, i32
  }
  func.func @transform_2(%arg0: i32, %arg1: i32) -> (i32, i32) {
    %c0_i32 = arith.constant 0 : i32
    %c0_i32_0 = arith.constant 0 : i32
    %c0_i32_1 = arith.constant 0 : i32
    return %c0_i32, %c0_i32_0 : i32, i32
  }
  func.func @transform_3(%arg0: i32, %arg1: i32) -> (i32, i32) {
    %c0_i32 = arith.constant 0 : i32
    %c0_i32_0 = arith.constant 0 : i32
    %c0_i32_1 = arith.constant 0 : i32
    return %c0_i32, %c0_i32_0 : i32, i32
  }
  func.func @transform_4(%arg0: i32, %arg1: i32) -> (i32, i32, i32) {
    %c0_i32 = arith.constant 0 : i32
    %c0_i32_0 = arith.constant 0 : i32
    return %arg0, %arg1, %c0_i32 : i32, i32, i32
  }
}

</mosaic_0001>

<bundles_post_ra>
// kernel: mylstm_forward.3
= control target key start
LH: loop header
LB: loop body
LE: loop exit
PB: predicated region body
PF: predicated region fallthrough
CT: control target
= control target key end

     0   :  { %s1658_s15 = smov 0   ;;  %s1660_s16 = smov 0   ;;  %s1845_s0 = inlined_call_operand.vmem [shape: f32[2,8,32], index: 0, kind: input, shape index: {}]   ;;  %s1846_s1 = inlined_call_operand.vmem [shape: f32[32,128], index: 1, kind: input, shape index: {}]   ;;  %s1847_s2 = inlined_call_operand.vmem [shape: f32[32,128], index: 2, kind: input, shape index: {}]   ;;  %s1848_s3 = inlined_call_operand.vmem [shape: f32[1,128], index: 3, kind: input, shape index: {}]   ;;  %s1849_s4 = inlined_call_operand.vmem [shape: f32[2,8,32], index: 4, kind: output, shape index: {}]  }
   0x1   :  { %s1662_s17 = smov 0  }
   0x2 LB: > { %s26_s18 = sadd.s32 1, %s1621_s16  ;;  %p1287_p0 = scmp.ge.s32.totalorder %s1625_s17, 1  ;;  %s1625_s17 = sphi %s1662_s17, %s14_s17   ;;  %s1621_s16 = sphi %s1660_s16, %s1851_s16   ;;  %s1617_s15 = sphi %s1658_s15, %s1850_s15  }
   0x3   : > { %p28_p1 = scmp.ge.s32.totalorder %s26_s18, 2  ;;  %p180_p2 = scmp.lt.s32.totalorder %s1625_s17, 3 }
   0x5   : > { %s1853_s18 = smov (%p28_p1, %s26_s18), 0  ;;  %p181_p3 = pnand %p1287_p0, %p180_p2 }
   0x6   : > { %v232_v0 = vld [vmem:[%s1846_s1] sm:$0xff] (!%p181_p3)  ;;  %v233_v1 = vld [vmem:[%s1846_s1 + $0x8] sm:$0xff] (!%p181_p3)  ;;  %v1627_v3 = vmov (!%p181_p3), 0.0|0.0   ;;  %v234_v6 = vld [vmem:[%s1846_s1 + $0x10] sm:$0xff] (!%p181_p3)  ;;  %p210_p4 = scmp.lt.s32.totalorder (!%p181_p3), %s1617_s15, 1  ;;  %vm228_vm0 = vcmask (!%p181_p3), 253952  }
   0x7   : > { %184 = sbr.rel (%p181_p3) target bundleno = 5668 (0x1624), region = 36  ;;  %v318_v2 = vld [vmem:[%s1847_s2] sm:$0xff] (!%p181_p3)  ;;  %1455 = vmatprep.subr.bf16.mxu0 (!%p181_p3), %v1627_v3  ;;  %v1456_v4 = vpack.c.bf16 (!%p181_p3), %v233_v1, %v232_v0  ;;  %1461 = vmatprep.subr.bf16.mxu1 (!%p181_p3), %v1627_v3  ;;  %v319_v5 = vld [vmem:[%s1847_s2 + $0x8] sm:$0xff] (!%p181_p3)  ;;  %v235_v7 = vld [vmem:[%s1846_s1 + $0x18] sm:$0xff] (!%p181_p3)  ;;  %vm1628_vm1 = vmmov (!%p181_p3), 0   ;;  %v1629_v11 = vmov (!%p181_p3), 0.0  }
   0x8   : > { %v1699_v8 = vpack.c.bf16 (!%p181_p3), %v319_v5, %v318_v2  ;;  %v320_v9 = vld [vmem:[%s1847_s2 + $0x10] sm:$0xff] (!%p181_p3)  ;;  %v321_v10 = vld [vmem:[%s1847_s2 + $0x18] sm:$0xff] (!%p181_p3)  ;;  %1364 = vmatprep.mubr.msk.f32.mxu0 (!%p181_p3), %vm1628_vm1, %v1629_v11  ;;  %1375 = vmatprep.mubr.msk.f32.mxu1 (!%p181_p3), %vm1628_vm1, %v1629_v11  ;;  %229 = vst.msk [vmem:[#allocation2] sm:$0x1] (!%p181_p3), %vm228_vm0, %v1629_v11  ;;  %230 = vst.msk [vmem:[#allocation3] sm:$0x1] (!%p181_p3), %vm228_vm0, %v1629_v11  ;;  %v1459_v12 = vpack.c.bf16 (!%p181_p3), %v235_v7, %v234_v6 }
   0x9   : > { %1457 = vmatpush3.bf16.msra.mxu0 (!%p181_p3), %v1456_v4  ;;  %v1718_v13 = vpack.c.bf16 (!%p181_p3), %v321_v10, %v320_v9  ;;  %vm243_vm2 = vcmask (!%p181_p3), 261120   ;;  %v1290_v16 = vld [vmem:[%s1848_s3] ss:$0 sm:$0xff] (!%p181_p3)  ;;  %s1630_s19 = smov (!%p181_p3), 32   ;;  %s1631_s20 = smov (!%p181_p3), 64   ;;  %vm1179_vm3 = vcmask (!%p181_p3), 1040384  }
   0xa   : > { %1463 = vmatpush3.bf16.msra.mxu1 (!%p181_p3), %v1699_v8  ;;  %1458 = vmatprep.subr.bf16.mxu0 (!%p181_p3), %v1627_v3  ;;  %vm1181_vm4 = vcmask (!%p181_p3), 1041408   ;;  %vm1183_vm5 = vcmask (!%p181_p3), 1042432   ;;  %vm1185_vm6 = vcmask (!%p181_p3), 1043456   ;;  %vm1187_vm7 = vcmask (!%p181_p3), 1044480   ;;  %s1632_s21 = smov (!%p181_p3), 96  }
   0xb   : > { %1464 = vmatprep.subr.bf16.mxu1 (!%p181_p3), %v1627_v3  ;;  %vm1189_vm8 = vcmask (!%p181_p3), 1045504   ;;  %vm1191_vm9 = vcmask (!%p181_p3), 1046528   ;;  %vm1202_vm10 = vcmask (!%p181_p3), 261127  }
   0xd   : > { %1460 = vmatpush3.bf16.msra.mxu0 (!%p181_p3), %v1459_v12 }
   0xe   : > { %s1855_s15 = smov (!%p210_p4, %s1617_s15), 1  ;;  %1466 = vmatpush3.bf16.msra.mxu1 %v1718_v13  ;;  %1467 = vmatprep.subr.bf16.mxu0 %v1627_v3 }
   0xf   : > { %s1288_s9 = sshll.u32 %s1855_s15, 3  ;;  %v322_v15 = vld [vmem:[#allocation2] sm:$0x1]  ;;  %1473 = vmatprep.subr.bf16.mxu1 %v1627_v3  ;;  %v1294_v24 = vld [vmem:[#allocation3] ss:$0 sm:$0xff] }
  0x10   : > { %s216_s12 = scalar_lea.vmem %s1845_s0, %s1288_s9  ;;  %s223_s24 = scalar_lea.vmem %s1849_s4, %s1288_s9 }
  0x11   : > { %v231_v14 = vld [vmem:[%s216_s12] sm:$0xff]  ;;  %1376 = vmatmul.mubr.msk.f32.vlgmr.msra.gmra.mrb[0].mxu1 %vm243_vm2, %v322_v15 }
  0x12   : > { %1365 = vmatmul.mubr.msk.f32.vlgmr.msra.gmra.mrb[0].mxu0 %vm243_vm2, %v231_v14  ;;  %1475 = vmatpush3.bf16.msra.mxu1 %v1699_v8 }
  0x13   : > { %1469 = vmatpush3.bf16.msra.mxu0 %v1699_v8  ;;  %1386 = vmatprep.mubr.msk.f32.mxu0 %vm1628_vm1, %v1629_v11 }
  0x14   : > { %1470 = vmatprep.subr.bf16.mxu0 %v1627_v3  ;;  %1397 = vmatprep.mubr.msk.f32.mxu1 %vm1628_vm1, %v1629_v11 }
  0x15   : > { %1476 = vmatprep.subr.bf16.mxu1 %v1627_v3 }
  0x16   : > { %1478 = vmatpush3.bf16.msra.mxu1 %v1718_v13 }
  0x17   : > { %1472 = vmatpush3.bf16.msra.mxu0 %v1718_v13  ;;  %1485 = vmatprep.subr.bf16.mxu1 %v1627_v3 }
  0x18   : > { %1479 = vmatprep.subr.bf16.mxu0 %v1627_v3 }
  0xe4   : > { %v394_v20 = vpop.f32.mrb[0].mxu1 }
  0xe5   : > { %v313_v17 = vpop.f32.mrb[0].mxu0  ;;  %v1377_v21 = vpop.f32.mrb[1].mxu1 }
  0xe6   : > { %v1747_v18 = vadd.f32 %v1290_v16, %v313_v17  ;;  %v1366_v19 = vpop.f32.mrb[1].mxu0 }
  0xe8   : > { %v398_v22 = vadd.f32 %v394_v20, %v1747_v18 }
  0xea   : > { %1539 = vtanh.f32 %v398_v22  ;;  %v1293_v25 = vmul.f32 -1.442695, %v398_v22 }
  0xec   : > { %1541 = vpow2.f32 %v1293_v25 }
  0xf4   : > { %v1540_v23 = vpop.eup %1539 }
  0xf5   : > { %416 = vrot.lane.b32.xlu0 %v1540_v23, %s1630_s19 }
  0xf6   : > { %v1542_v26 = vpop.eup %1541 }
  0xf7   : > { %v402_v27 = vadd.f32 1.0, %v1542_v26 }
  0xf9   : > { %411 = vrot.lane.b32.xlu0 %v1294_v24, %s1630_s19  ;;  %1543 = vrcp.f32 %v402_v27 }
 0x103   : > { %v1544_v28 = vpop.eup %1543 }
 0x167   : > { %v417_v29 = vpop.permute.xlu0 %416 }
 0x168   : > { %v419_v30 = vmul.f32 %v1544_v28, %v417_v29 }
 0x16a   : > { %421 = vrot.lane.b32.xlu1 %v419_v30, %s1630_s19 }
 0x16b   : > { %v412_v31 = vpop.permute.xlu0 %411 }
 0x16c   : > { %v414_v32 = vmul.f32 %v1544_v28, %v412_v31 }
 0x1dc   : > { %v422_v33 = vpop.permute.xlu1 %421 }
 0x1dd   : > { %v424_v34 = vadd.f32 %v422_v33, %v414_v32 }
 0x1df   : > { %1545 = vtanh.f32 %v424_v34  ;;  %v518_v50 = vrot.slane %v424_v34, 7 }
 0x1e9   : > { %v1546_v35 = vpop.eup %1545 }
 0x1ea   : > { %427 = vrot.lane.b32.xlu1 %v1546_v35, %s1630_s19 }
 0x25c   : > { %v428_v36 = vpop.permute.xlu1 %427 }
 0x25d   : > { %v1754_v37 = vmul.f32 %v1544_v28, %v428_v36 }
 0x25f   : > { %432 = vrot.lane.b32.xlu0 %v1754_v37, %s1631_s20 }
 0x2d1   : > { %v433_v38 = vpop.permute.xlu0 %432 }
 0x2d2   : > { %1387 = vmatmul.mubr.msk.f32.vlgmr.msra.gmra.mrb[2].mxu0 %vm243_vm2, %v433_v38 }
 0x2d3   : > { %1481 = vmatpush3.bf16.msra.mxu0 %v1699_v8  ;;  %1408 = vmatprep.mubr.msk.f32.mxu0 %vm1628_vm1, %v1629_v11 }
 0x2d4   : > { %1482 = vmatprep.subr.bf16.mxu0 %v1627_v3 }
 0x2d7   : > { %1484 = vmatpush3.bf16.msra.mxu0 %v1718_v13 }
 0x2d8   : > { %1491 = vmatprep.subr.bf16.mxu0 %v1627_v3 }
 0x3a5   : > { %v502_v39 = vpop.f32.mrb[2].mxu0 }
 0x3a6   : > { %v507_v40 = vrot.slane %v502_v39, 7  ;;  %v1388_v41 = vpop.f32.mrb[3].mxu0 }
 0x3a8   : > { %v509_v42 = vadd.f32 %v507_v40, %v1747_v18 }
 0x3aa   : > { %1547 = vtanh.f32 %v509_v42  ;;  %v1296_v44 = vmul.f32 -1.442695, %v509_v42 }
 0x3ac   : > { %1549 = vpow2.f32 %v1296_v44 }
 0x3b4   : > { %v1548_v43 = vpop.eup %1547 }
 0x3b5   : > { %522 = vrot.lane.b32.xlu1 %v1548_v43, %s1630_s19 }
 0x3b6   : > { %v1550_v45 = vpop.eup %1549 }
 0x3b7   : > { %v513_v46 = vadd.f32 1.0, %v1550_v45 }
 0x3b9   : > { %1551 = vrcp.f32 %v513_v46 }
 0x3c3   : > { %v1552_v47 = vpop.eup %1551 }
 0x3c4   : > { %v520_v51 = vmul.f32 %v1552_v47, %v518_v50 }
 0x427   : > { %v523_v48 = vpop.permute.xlu1 %522 }
 0x428   : > { %v525_v49 = vmul.f32 %v1552_v47, %v523_v48 }
 0x42a   : > { %527 = vrot.lane.b32.xlu0 %v525_v49, %s1630_s19 }
 0x49c   : > { %v528_v52 = vpop.permute.xlu0 %527 }
 0x49d   : > { %v530_v53 = vadd.f32 %v528_v52, %v520_v51 }
 0x49f   : > { %1553 = vtanh.f32 %v530_v53  ;;  %v625_v7 = vrot.slane %v530_v53, 7 }
 0x4a9   : > { %v1554_v54 = vpop.eup %1553 }
 0x4aa   : > { %533 = vrot.lane.b32.xlu1 %v1554_v54, %s1630_s19 }
 0x51c   : > { %v534_v55 = vpop.permute.xlu1 %533 }
 0x51d   : > { %v536_v56 = vmul.f32 %v1552_v47, %v534_v55 }
 0x51f   : > { %v538_v57 = vrot.slane %v536_v56, 1  ;;  %v1180_v17 = vsel %vm1179_vm3, %v1754_v37, %v536_v56 }
 0x521   : > { %539 = vrot.lane.b32.xlu0 %v538_v57, %s1631_s20 }
 0x593   : > { %v540_v58 = vpop.permute.xlu0 %539 }
 0x594   : > { %1398 = vmatmul.mubr.msk.f32.vlgmr.msra.gmra.mrb[2].mxu1 %vm243_vm2, %v540_v58 }
 0x595   : > { %1487 = vmatpush3.bf16.msra.mxu1 %v1699_v8  ;;  %1419 = vmatprep.mubr.msk.f32.mxu1 %vm1628_vm1, %v1629_v11 }
 0x596   : > { %1488 = vmatprep.subr.bf16.mxu1 %v1627_v3 }
 0x599   : > { %1490 = vmatpush3.bf16.msra.mxu1 %v1718_v13 }
 0x59a   : > { %1497 = vmatprep.subr.bf16.mxu1 %v1627_v3 }
 0x667   : > { %v609_v59 = vpop.f32.mrb[2].mxu1 }
 0x668   : > { %v614_v60 = vrot.slane %v609_v59, 6  ;;  %v1399_v61 = vpop.f32.mrb[3].mxu1 }
 0x66a   : > { %v616_v62 = vadd.f32 %v614_v60, %v1747_v18 }
 0x66c   : > { %1555 = vtanh.f32 %v616_v62  ;;  %v1298_v0 = vmul.f32 -1.442695, %v616_v62 }
 0x66e   : > { %1557 = vpow2.f32 %v1298_v0 }
 0x676   : > { %v1556_v63 = vpop.eup %1555 }
 0x677   : > { %629 = vrot.lane.b32.xlu1 %v1556_v63, %s1630_s19 }
 0x678   : > { %v1558_v1 = vpop.eup %1557 }
 0x679   : > { %v620_v2 = vadd.f32 1.0, %v1558_v1 }
 0x67b   : > { %1559 = vrcp.f32 %v620_v2 }
 0x685   : > { %v1560_v4 = vpop.eup %1559 }
 0x686   : > { %v627_v9 = vmul.f32 %v1560_v4, %v625_v7 }
 0x6e9   : > { %v630_v5 = vpop.permute.xlu1 %629 }
 0x6ea   : > { %v632_v6 = vmul.f32 %v1560_v4, %v630_v5 }
 0x6ec   : > { %634 = vrot.lane.b32.xlu0 %v632_v6, %s1630_s19 }
 0x75e   : > { %v635_v10 = vpop.permute.xlu0 %634 }
 0x75f   : > { %v637_v12 = vadd.f32 %v635_v10, %v627_v9 }
 0x761   : > { %1561 = vtanh.f32 %v637_v12  ;;  %v732_v33 = vrot.slane %v637_v12, 7 }
 0x76b   : > { %v1562_v14 = vpop.eup %1561 }
 0x76c   : > { %640 = vrot.lane.b32.xlu1 %v1562_v14, %s1630_s19 }
 0x7de   : > { %v641_v15 = vpop.permute.xlu1 %640 }
 0x7df   : > { %v643_v16 = vmul.f32 %v1560_v4, %v641_v15 }
 0x7e1   : > { %v645_v19 = vrot.slane %v643_v16, 2  ;;  %v1182_v20 = vsel %vm1181_vm4, %v1180_v17, %v643_v16 }
 0x7e3   : > { %646 = vrot.lane.b32.xlu0 %v645_v19, %s1631_s20 }
 0x855   : > { %v647_v21 = vpop.permute.xlu0 %646 }
 0x856   : > { %1409 = vmatmul.mubr.msk.f32.vlgmr.msra.gmra.mrb[4].mxu0 %vm243_vm2, %v647_v21 }
 0x857   : > { %1493 = vmatpush3.bf16.msra.mxu0 %v1699_v8  ;;  %1430 = vmatprep.mubr.msk.f32.mxu0 %vm1628_vm1, %v1629_v11 }
 0x858   : > { %1494 = vmatprep.subr.bf16.mxu0 %v1627_v3 }
 0x85b   : > { %1496 = vmatpush3.bf16.msra.mxu0 %v1718_v13 }
 0x85c   : > { %1503 = vmatprep.subr.bf16.mxu0 %v1627_v3 }
 0x929   : > { %v716_v22 = vpop.f32.mrb[4].mxu0 }
 0x92a   : > { %v721_v23 = vrot.slane %v716_v22, 5  ;;  %v1410_v24 = vpop.f32.mrb[5].mxu0 }
 0x92c   : > { %v723_v25 = vadd.f32 %v721_v23, %v1747_v18 }
 0x92e   : > { %1563 = vtanh.f32 %v723_v25  ;;  %v1300_v27 = vmul.f32 -1.442695, %v723_v25 }
 0x930   : > { %1565 = vpow2.f32 %v1300_v27 }
 0x938   : > { %v1564_v26 = vpop.eup %1563 }
 0x939   : > { %736 = vrot.lane.b32.xlu1 %v1564_v26, %s1630_s19 }
 0x93a   : > { %v1566_v28 = vpop.eup %1565 }
 0x93b   : > { %v727_v29 = vadd.f32 1.0, %v1566_v28 }
 0x93d   : > { %1567 = vrcp.f32 %v727_v29 }
 0x947   : > { %v1568_v30 = vpop.eup %1567 }
 0x948   : > { %v734_v34 = vmul.f32 %v1568_v30, %v732_v33 }
 0x9ab   : > { %v737_v31 = vpop.permute.xlu1 %736 }
 0x9ac   : > { %v739_v32 = vmul.f32 %v1568_v30, %v737_v31 }
 0x9ae   : > { %741 = vrot.lane.b32.xlu0 %v739_v32, %s1630_s19 }
 0xa20   : > { %v742_v35 = vpop.permute.xlu0 %741 }
 0xa21   : > { %v744_v36 = vadd.f32 %v742_v35, %v734_v34 }
 0xa23   : > { %1569 = vtanh.f32 %v744_v36  ;;  %v839_v54 = vrot.slane %v744_v36, 7 }
 0xa2d   : > { %v1570_v37 = vpop.eup %1569 }
 0xa2e   : > { %747 = vrot.lane.b32.xlu1 %v1570_v37, %s1630_s19 }
 0xaa0   : > { %v748_v38 = vpop.permute.xlu1 %747 }
 0xaa1   : > { %v750_v39 = vmul.f32 %v1568_v30, %v748_v38 }
 0xaa3   : > { %v752_v40 = vrot.slane %v750_v39, 3  ;;  %v1184_v41 = vsel %vm1183_vm5, %v1182_v20, %v750_v39 }
 0xaa5   : > { %753 = vrot.lane.b32.xlu0 %v752_v40, %s1631_s20 }
 0xb17   : > { %v754_v42 = vpop.permute.xlu0 %753 }
 0xb18   : > { %1420 = vmatmul.mubr.msk.f32.vlgmr.msra.gmra.mrb[4].mxu1 %vm243_vm2, %v754_v42 }
 0xb19   : > { %1499 = vmatpush3.bf16.msra.mxu1 %v1699_v8  ;;  %1441 = vmatprep.mubr.msk.f32.mxu1 %vm1628_vm1, %v1629_v11 }
 0xb1a   : > { %1500 = vmatprep.subr.bf16.mxu1 %v1627_v3 }
 0xb1d   : > { %1502 = vmatpush3.bf16.msra.mxu1 %v1718_v13 }
 0xbeb   : > { %v823_v43 = vpop.f32.mrb[4].mxu1 }
 0xbec   : > { %v828_v44 = vrot.slane %v823_v43, 4  ;;  %v1421_v45 = vpop.f32.mrb[5].mxu1 }
 0xbee   : > { %v830_v46 = vadd.f32 %v828_v44, %v1747_v18 }
 0xbf0   : > { %1571 = vtanh.f32 %v830_v46  ;;  %v1302_v48 = vmul.f32 -1.442695, %v830_v46 }
 0xbf2   : > { %1573 = vpow2.f32 %v1302_v48 }
 0xbfa   : > { %v1572_v47 = vpop.eup %1571 }
 0xbfb   : > { %843 = vrot.lane.b32.xlu1 %v1572_v47, %s1630_s19 }
 0xbfc   : > { %v1574_v49 = vpop.eup %1573 }
 0xbfd   : > { %v834_v50 = vadd.f32 1.0, %v1574_v49 }
 0xbff   : > { %1575 = vrcp.f32 %v834_v50 }
 0xc09   : > { %v1576_v51 = vpop.eup %1575 }
 0xc0a   : > { %v841_v55 = vmul.f32 %v1576_v51, %v839_v54 }
 0xc6d   : > { %v844_v52 = vpop.permute.xlu1 %843 }
 0xc6e   : > { %v846_v53 = vmul.f32 %v1576_v51, %v844_v52 }
 0xc70   : > { %848 = vrot.lane.b32.xlu0 %v846_v53, %s1630_s19 }
 0xce2   : > { %v849_v56 = vpop.permute.xlu0 %848 }
 0xce3   : > { %v851_v57 = vadd.f32 %v849_v56, %v841_v55 }
 0xce5   : > { %1577 = vtanh.f32 %v851_v57 }
 0xcef   : > { %v1578_v58 = vpop.eup %1577 }
 0xcf0   : > { %854 = vrot.lane.b32.xlu1 %v1578_v58, %s1630_s19 }
 0xd62   : > { %v855_v59 = vpop.permute.xlu1 %854 }
 0xd63   : > { %v857_v60 = vmul.f32 %v1576_v51, %v855_v59 }
 0xd65   : > { %v859_v61 = vrot.slane %v857_v60, 4  ;;  %v1186_v62 = vsel %vm1185_vm6, %v1184_v41, %v857_v60 }
 0xd67   : > { %860 = vrot.lane.b32.xlu0 %v859_v61, %s1631_s20 }
 0xdd9   : > { %v861_v63 = vpop.permute.xlu0 %860 }
 0xdda   : > { %1431 = vmatmul.mubr.msk.f32.vlgmr.msra.gmra.mrb[6].mxu0 %vm243_vm2, %v861_v63 }
 0xddb   : > { %1505 = vmatpush3.bf16.msra.mxu0 %v1699_v8  ;;  %1452 = vmatprep.mubr.msk.f32.mxu0 %vm1628_vm1, %v1629_v11 }
 0xddc   : > { %1506 = vmatprep.subr.bf16.mxu0 %v1627_v3  ;;  %v946_v3 = vrot.slane %v851_v57, 7 }
 0xddf   : > { %1508 = vmatpush3.bf16.msra.mxu0 %v1718_v13 }
 0xead   : > { %v930_v0 = vpop.f32.mrb[6].mxu0 }
 0xeae   : > { %v935_v1 = vrot.slane %v930_v0, 3  ;;  %v1432_v2 = vpop.f32.mrb[7].mxu0 }
 0xeb0   : > { %v937_v4 = vadd.f32 %v935_v1, %v1747_v18 }
 0xeb2   : > { %1579 = vtanh.f32 %v937_v4  ;;  %v1304_v6 = vmul.f32 -1.442695, %v937_v4 }
 0xeb4   : > { %1581 = vpow2.f32 %v1304_v6 }
 0xebc   : > { %v1580_v5 = vpop.eup %1579 }
 0xebd   : > { %950 = vrot.lane.b32.xlu1 %v1580_v5, %s1630_s19 }
 0xebe   : > { %v1582_v7 = vpop.eup %1581 }
 0xebf   : > { %v941_v8 = vadd.f32 1.0, %v1582_v7 }
 0xec1   : > { %1583 = vrcp.f32 %v941_v8 }
 0xecb   : > { %v1584_v9 = vpop.eup %1583 }
 0xecc   : > { %v948_v13 = vmul.f32 %v1584_v9, %v946_v3 }
 0xf2f   : > { %v951_v11 = vpop.permute.xlu1 %950 }
 0xf30   : > { %v953_v10 = vmul.f32 %v1584_v9, %v951_v11 }
 0xf32   : > { %955 = vrot.lane.b32.xlu0 %v953_v10, %s1630_s19 }
 0xfa4   : > { %v956_v12 = vpop.permute.xlu0 %955 }
 0xfa5   : > { %v958_v14 = vadd.f32 %v956_v12, %v948_v13 }
 0xfa7   : > { %1585 = vtanh.f32 %v958_v14  ;;  %v1053_v33 = vrot.slane %v958_v14, 7 }
 0xfb1   : > { %v1586_v15 = vpop.eup %1585 }
 0xfb2   : > { %961 = vrot.lane.b32.xlu1 %v1586_v15, %s1630_s19 }
0x1024   : > { %v962_v16 = vpop.permute.xlu1 %961 }
0x1025   : > { %v964_v17 = vmul.f32 %v1584_v9, %v962_v16 }
0x1027   : > { %v966_v19 = vrot.slane %v964_v17, 5  ;;  %v1188_v20 = vsel %vm1187_vm7, %v1186_v62, %v964_v17 }
0x1029   : > { %967 = vrot.lane.b32.xlu0 %v966_v19, %s1631_s20 }
0x109b   : > { %v968_v21 = vpop.permute.xlu0 %967 }
0x109c   : > { %1442 = vmatmul.mubr.msk.f32.vlgmr.msra.gmra.mrb[6].mxu1 %vm243_vm2, %v968_v21 }
0x116f   : > { %v1037_v22 = vpop.f32.mrb[6].mxu1 }
0x1170   : > { %v1042_v23 = vrot.slane %v1037_v22, 2  ;;  %v1443_v24 = vpop.f32.mrb[7].mxu1 }
0x1172   : > { %v1044_v25 = vadd.f32 %v1042_v23, %v1747_v18 }
0x1174   : > { %1587 = vtanh.f32 %v1044_v25  ;;  %v1306_v27 = vmul.f32 -1.442695, %v1044_v25 }
0x1176   : > { %1589 = vpow2.f32 %v1306_v27 }
0x117e   : > { %v1588_v26 = vpop.eup %1587 }
0x117f   : > { %1057 = vrot.lane.b32.xlu1 %v1588_v26, %s1630_s19 }
0x1180   : > { %v1590_v28 = vpop.eup %1589 }
0x1181   : > { %v1048_v29 = vadd.f32 1.0, %v1590_v28 }
0x1183   : > { %1591 = vrcp.f32 %v1048_v29 }
0x118d   : > { %v1592_v30 = vpop.eup %1591 }
0x118e   : > { %v1055_v34 = vmul.f32 %v1592_v30, %v1053_v33 }
0x11f1   : > { %v1058_v31 = vpop.permute.xlu1 %1057 }
0x11f2   : > { %v1060_v32 = vmul.f32 %v1592_v30, %v1058_v31 }
0x11f4   : > { %1062 = vrot.lane.b32.xlu0 %v1060_v32, %s1630_s19 }
0x1266   : > { %v1063_v35 = vpop.permute.xlu0 %1062 }
0x1267   : > { %v1065_v36 = vadd.f32 %v1063_v35, %v1055_v34 }
0x1269   : > { %1593 = vtanh.f32 %v1065_v36  ;;  %v1160_v54 = vrot.slane %v1065_v36, 7 }
0x1273   : > { %v1594_v37 = vpop.eup %1593 }
0x1274   : > { %1068 = vrot.lane.b32.xlu1 %v1594_v37, %s1630_s19 }
0x12e6   : > { %v1069_v38 = vpop.permute.xlu1 %1068 }
0x12e7   : > { %v1071_v39 = vmul.f32 %v1592_v30, %v1069_v38 }
0x12e9   : > { %v1073_v40 = vrot.slane %v1071_v39, 6  ;;  %v1190_v41 = vsel %vm1189_vm8, %v1188_v20, %v1071_v39 }
0x12eb   : > { %1074 = vrot.lane.b32.xlu0 %v1073_v40, %s1631_s20 }
0x135d   : > { %v1075_v42 = vpop.permute.xlu0 %1074 }
0x135e   : > { %1453 = vmatmul.mubr.msk.f32.vlgmr.msra.gmra.mrb[8].mxu0 %vm243_vm2, %v1075_v42 }
0x1431   : > { %v1144_v43 = vpop.f32.mrb[8].mxu0 }
0x1432   : > { %v1149_v44 = vrot.slane %v1144_v43, 1  ;;  %v1454_v45 = vpop.f32.mrb[9].mxu0 }
0x1434   : > { %v1151_v46 = vadd.f32 %v1149_v44, %v1747_v18 }
0x1436   : > { %1595 = vtanh.f32 %v1151_v46  ;;  %v1308_v48 = vmul.f32 -1.442695, %v1151_v46 }
0x1438   : > { %1597 = vpow2.f32 %v1308_v48 }
0x1440   : > { %v1596_v47 = vpop.eup %1595 }
0x1441   : > { %1164 = vrot.lane.b32.xlu1 %v1596_v47, %s1630_s19 }
0x1442   : > { %v1598_v49 = vpop.eup %1597 }
0x1443   : > { %v1155_v50 = vadd.f32 1.0, %v1598_v49 }
0x1445   : > { %1599 = vrcp.f32 %v1155_v50 }
0x144f   : > { %v1600_v51 = vpop.eup %1599 }
0x1450   : > { %v1162_v55 = vmul.f32 %v1600_v51, %v1160_v54 }
0x14b3   : > { %v1165_v52 = vpop.permute.xlu1 %1164 }
0x14b4   : > { %v1167_v53 = vmul.f32 %v1600_v51, %v1165_v52 }
0x14b6   : > { %1169 = vrot.lane.b32.xlu0 %v1167_v53, %s1630_s19 }
0x1528   : > { %v1170_v56 = vpop.permute.xlu0 %1169 }
0x1529   : > { %v1172_v57 = vadd.f32 %v1170_v56, %v1162_v55 }
0x152b   : > { %1601 = vtanh.f32 %v1172_v57 }
0x1535   : > { %v1602_v18 = vpop.eup %1601 }
0x1536   : > { %1175 = vrot.lane.b32.xlu1 %v1602_v18, %s1630_s19 }
0x15a8   : > { %v1176_v58 = vpop.permute.xlu1 %1175 }
0x15a9   : > { %v1178_v59 = vmul.f32 %v1600_v51, %v1176_v58 }
0x15ab   : > { %1199 = vrot.lane.b32.xlu1 %v1178_v59, %s1631_s20  ;;  %v1192_v60 = vsel %vm1191_vm9, %v1190_v41, %v1178_v59 }
0x15ac   : > { %1194 = vrot.lane.b32.xlu0 %v1192_v60, %s1631_s20 }
0x15b0   : > { %1205 = vrot.lane.b32.xlu0 %v1172_v57, %s1632_s21 }
0x161d   : > { %v1200_v61 = vpop.permute.xlu1 %1199 }
0x161e   : > { %1203 = vst.msk [vmem:[#allocation2 - $0x7] sm:$0x80] %vm1202_vm10, %v1200_v61  ;;  %v1195_v62 = vpop.permute.xlu0 %1194 }
0x161f   : > { %1197 = vst.msk [vmem:[%s223_s24] sm:$0xff] %vm243_vm2, %v1195_v62 }
0x1622   : > { %v1206_v63 = vpop.permute.xlu0 %1205 }
0x1623   : > { %1208 = vst.msk [vmem:[#allocation3 - $0x7] sm:$0x80] %vm1202_vm10, %v1206_v63 }
0x1624 PF: > { %s14_s17 = sadd.s32 1, %s1625_s17   ;;  %s1850_s15 = smov %s1621_s16 }
0x1625   : > { %p11_p5 = scmp.ge.s32.totalorder %s14_s17, 4   ;;  %s1851_s16 = smov %s1853_s18 }
0x1627   :  { %13 = sbr.rel (!%p11_p5) target bundleno = 2 (0x2), region = 70 }

// kernel: mylstm_forward.2
= control target key start
LH: loop header
LB: loop body
LE: loop exit
PB: predicated region body
PF: predicated region fallthrough
CT: control target
= control target key end

     0   :  { %9 = vsyncpa [#allocation6], 0  ;;  %s2211_s0 = inlined_call_operand.hbm [shape: f32[2,8,16], index: 0, kind: input, shape index: {}]   ;;  %s2212_s1 = inlined_call_operand.hbm [shape: f32[16,128], index: 1, kind: input, shape index: {}]   ;;  %s2213_s2 = inlined_call_operand.hbm [shape: f32[32,128], index: 2, kind: input, shape index: {}]   ;;  %s2214_s3 = inlined_call_operand.vmem [shape: f32[1,128], index: 3, kind: input, shape index: {}]   ;;  %s2215_s4 = inlined_call_operand.vmem [shape: f32[2,8,32], index: 4, kind: output, shape index: {}]  }
   0x1   :  { %11 = vsyncpa [#allocation6 + $0x1], 0 }
   0x2   :  { %12 = vsyncpa [#allocation8], 0  ;;  %s1901_s15 = smov 0   ;;  %s1903_s16 = smov 0  }
   0x3   :  { %s1905_s17 = smov 0   ;;  %s1907_s18 = smov 0  }
   0x4   :  { %s1909_s19 = smov 0   ;;  %s1911_s20 = smov 0  }
   0x5 LB: > { %s1352_s21 = sadd.s32 4294967295, %s1863_s20   ;;  %p52_p0 = scmp.ne.s32.totalorder %s1847_s16, %s1843_s15  ;;  %s1863_s20 = sphi %s1911_s20, %s18_s20   ;;  %s1859_s19 = sphi %s1909_s19, %s2232_s19   ;;  %s1855_s18 = sphi %s1907_s18, %s2231_s18   ;;  %s1851_s17 = sphi %s1905_s17, %s2230_s17   ;;  %s1847_s16 = sphi %s1903_s16, %s2229_s16   ;;  %s1843_s15 = sphi %s1901_s15, %s2228_s15  }
   0x6   : > { %p1931_p1 = scmp.eq.s32.totalorder %s1352_s21, 0  ;;  %p1354_p2 = scmp.ge.s32.totalorder %s1863_s20, 1 }
   0x7   : > { %p154_p3 = scmp.lt.s32.totalorder %s1863_s20, 3  ;;  %s1865_s25 = smov [#allocation7]  }
   0x8   : > { %s2220_s22 = scalar_select %p1931_p1, 1, 0 }
   0x9   : > { %p1939_p4 = por %p1931_p1, %p52_p0  ;;  %p1943_p5 = pnand %p1354_p2, %p154_p3 }
   0xa   : > { %s166_s26 = sshll.u32 %s1865_s25, 4  ;;  %s1866_s28 = smov [#allocation9]   ;;  %s167_s26 = int_to_ptr.vmem [resolvable:$true] %s166_s26 }
   0xb   : > { %s2221_s23 = scalar_select %p1939_p4, 1, 0 }
   0xc   : > { %s2222_s24 = scalar_select %p1943_p5, 1, 0 }
   0xd   : > { %p1585_p6 = pneg %p1943_p5  ;;  %s179_s29 = sshll.u32 %s1866_s28, 4  ;;  %s1955_s29 = int_to_ptr.vmem [resolvable:$true] %s179_s29 }
   0xe   : > { %s1723_s6 = scalar_lea.hbm %s2212_s1, 256 }
   0xf   : > { %p1951_p7 = pnand %p1585_p6, %p1931_p1  ;;  %p1724_p8 = scmp.ne.s32.totalorder %s2212_s1, %s1723_s6 }
  0x10   : > { %p1730_p12 = scmp.lt.u32.totalorder %s1723_s6, %s2212_s1 }
  0x11   : > { %p1725_p9 = pneg %p1951_p7 }
  0x13   : > { %p1726_p10 = pnand %p1725_p9, %p1724_p8 }
  0x15   : > { %p1727_p11 = pneg %p1726_p10 }
  0x17   : > { %p1732_p13 = pnand %p1730_p12, %p1727_p11 }
  0x19   : > { %1735 = shalt.err (!%p1732_p13)
}
  0x1a   : > { %s1736_s11 = scalar_lea.vmem %s167_s26, 256  ;;  %p1744_p6 = scmp.lt.s32.totalorder %s167_s26, %s167_s26 }
  0x1b   : > { %p1737_p0 = scmp.ne.s32.totalorder %s167_s26, %s1736_s11  ;;  %p1745_p1 = scmp.lt.s32.totalorder %s1736_s11, %s1736_s11 }
  0x1d   : > { %p1739_p2 = pnand %p1737_p0, %p1725_p9  ;;  %p1746_p4 = por %p1745_p1, %p1744_p6 }
  0x1f   : > { %p1740_p3 = pneg %p1739_p2 }
  0x21   : > { %p1747_p5 = pnand %p1746_p4, %p1740_p3 }
  0x23   : > { %1750 = shalt.err (!%p1747_p5)
}
  0x24   : > { %s1867_s12 = smov 128   ;;  %s1868_s13 = smov 8  }
  0x25   : > { %1588 = dma.hbm_to_vmem [thread:$0]  (!%p1951_p7), %s2212_s1, 256, %s167_s26, [#allocation8], %s1867_s12, %s1867_s12, %s1868_s13  }
  0x26   : > { %s1751_s28 = scalar_lea.hbm %s2213_s2, 512 }
  0x27   : > { %p1752_p8 = scmp.ne.s32.totalorder %s2213_s2, %s1751_s28  ;;  %p1758_p5 = scmp.lt.u32.totalorder %s1751_s28, %s2213_s2 }
  0x29   : > { %p1754_p1 = pnand %p1752_p8, %p1725_p9 }
  0x2b   : > { %p1755_p4 = pneg %p1754_p1 }
  0x2d   : > { %p1760_p10 = pnand %p1758_p5, %p1755_p4 }
  0x2f   : > { %1763 = shalt.err (!%p1760_p10)
}
  0x30   : > { %s1764_s26 = scalar_lea.vmem %s1955_s29, 512  ;;  %p1772_p0 = scmp.lt.s32.totalorder %s1955_s29, %s1955_s29 }
  0x31   : > { %p1765_p11 = scmp.ne.s32.totalorder %s1955_s29, %s1764_s26  ;;  %p1773_p2 = scmp.lt.s32.totalorder %s1764_s26, %s1764_s26 }
  0x33   : > { %p1767_p12 = pnand %p1765_p11, %p1725_p9  ;;  %p1774_p3 = por %p1773_p2, %p1772_p0 }
  0x35   : > { %p1768_p13 = pneg %p1767_p12 }
  0x37   : > { %p1775_p6 = pnand %p1774_p3, %p1768_p13 }
  0x39   : > { %1778 = shalt.err (!%p1775_p6)
}
  0x3a   : > { %1591 = dma.hbm_to_vmem [thread:$0]  (!%p1951_p7), %s2213_s2, 512, %s1955_s29, [#allocation8], %s1867_s12, %s1867_s12, %s1868_s13  }
  0x3b   : > { %s30_s10 = sadd.s32 1, %s1859_s19  ;;  %s39_s11 = sadd.s32 1, %s1851_s17 }
  0x3c   : > { %p32_p9 = scmp.ge.s32.totalorder %s30_s10, 2  ;;  %p46_p8 = scmp.ne.s32.totalorder %s1851_s17, %s1847_s16 }
  0x3d   : > { %p47_p1 = scmp.eq.s32.totalorder %s1863_s20, 0  ;;  %p1598_p4 = scmp.lt.s32.totalorder %s1863_s20, 2 }
  0x3e   : > { %s2234_s10 = smov (%p32_p9, %s30_s10), 0  ;;  %s196_s27 = sand.u32 1, %s1851_s17  }
  0x3f   : > { %p48_p5 = por %p47_p1, %p46_p8  ;;  %s34_s14 = ssub.s32 %s1859_s19, %s2234_s10 }
  0x40   : > { %p37_p10 = scmp.eq.s32.totalorder %s34_s14, 0  ;;  %s1358_s15 = sshll.u32 %s196_s27, 3 }
  0x41   : > { %s1359_s21 = sshll.u32 %s1859_s19, 7  ;;  %s200_s13 = scalar_lea.vmem [#allocation5], %s1358_s15 }
  0x42   : > { %s2017_s25 = scalar_select %p37_p10, %s1851_s17, %s39_s11  }
  0x43   : > { %s2022_s12 = scalar_lea.hbm %s2211_s0, %s1359_s21  ;;  %s208_s30 = sshll.u32 %s200_s13, 4  ;;  %s2024_s30 = int_to_ptr.vmem [resolvable:$true] %s208_s30 }
  0x44   : > { %p2028_p7 = pnand %p1598_p4, %p48_p5  ;;  %s197_s6 = scalar_lea.sflag [#allocation6], %s196_s27 }
  0x45   : > { %s1779_s7 = scalar_lea.hbm %s2022_s12, 128  ;;  %s1784_s9 = scalar_lea.hbm %s2211_s0, 256 }
  0x46   : > { %p1780_p11 = scmp.ne.s32.totalorder %s2022_s12, %s1779_s7  ;;  %p1781_p12 = pneg %p2028_p7 }
  0x47   : > { %p1785_p2 = scmp.lt.u32.totalorder %s2022_s12, %s2211_s0  ;;  %p1786_p3 = scmp.lt.u32.totalorder %s1784_s9, %s1779_s7 }
  0x48   : > { %p1782_p13 = pnand %p1781_p12, %p1780_p11  ;;  %p1788_p9 = scmp.lt.u32.totalorder %s1779_s7, %s2022_s12 }
  0x49   : > { %p1787_p6 = por %p1786_p3, %p1785_p2 }
  0x4a   : > { %p1783_p0 = pneg %p1782_p13 }
  0x4b   : > { %p1789_p8 = por %p1788_p9, %p1787_p6 }
  0x4d   : > { %p1790_p1 = pnand %p1789_p8, %p1783_p0 }
  0x4f   : > { %1793 = shalt.err (!%p1790_p1)
}
  0x50   : > { %s1794_s27 = scalar_lea.vmem %s2024_s30, 128  ;;  %s1869_s15 = smov [#allocation5]  }
  0x51   : > { %p1795_p4 = scmp.ne.s32.totalorder %s2024_s30, %s1794_s27  ;;  %s1799_s21 = sshll.u32 %s1869_s15, 4  ;;  %s1800_s21 = int_to_ptr.vmem [resolvable:$false] %s1799_s21 }
  0x52   : > { %s1801_s28 = scalar_lea.vmem %s1800_s21, 256  ;;  %p1802_p11 = scmp.lt.s32.totalorder %s2024_s30, %s1800_s21 }
  0x53   : > { %p1797_p5 = pnand %p1795_p4, %p1781_p12  ;;  %p1803_p13 = scmp.lt.s32.totalorder %s1801_s28, %s1794_s27 }
  0x55   : > { %p1798_p10 = pneg %p1797_p5  ;;  %p1804_p2 = por %p1803_p13, %p1802_p11 }
  0x57   : > { %p1805_p3 = pnand %p1804_p2, %p1798_p10 }
  0x59   : > { %1808 = shalt.err (!%p1805_p3)
}
  0x5a   : > { %1595 = dma.hbm_to_vmem [thread:$0]  (!%p2028_p7), %s2022_s12, 128, %s2024_s30, %s197_s6  }
  0x5b   : > { %p2225_p0 = scmp.ne.s32.totalorder %s2222_s24, 0 }
  0x5c   : > { %s219_s29 = sand.u32 (!%p2225_p0), 1, %s1847_s16   ;;  %p2226_p12 = scmp.ne.s32.totalorder (!%p2225_p0), %s2221_s23, 0 }
  0x5d   : > { %217 = sbr.rel (%p2225_p0) target bundleno = 5763 (0x1683), region = 36  ;;  %s2060_s13 = sshll.u32 (!%p2225_p0), %s219_s29, 3 }
  0x5e   : > { %s220_s7 = scalar_lea.sflag (!%p2225_p0), [#allocation6], %s219_s29  ;;  %s223_s26 = scalar_lea.vmem (!%p2225_p0), [#allocation5], %s2060_s13 }
  0x64   : > { %1834 = dma.done.wait (%p2226_p12), %s220_s7, 128  }
  0x65   : > { %1836 = vsyncadd (%p2226_p12), %s220_s7, 4294967168  ;;  %p2227_p6 = scmp.ne.s32.totalorder %s2220_s22, 0 }
  0x67   : > { %1838 = dma.done.wait (%p2227_p6), [#allocation8], 768  }
  0x68   : > { %1840 = vsyncadd (%p2227_p6), [#allocation8], 4294966528  ;;  %v1870_v0 = vmov 0.0|0.0   ;;  %vm269_vm0 = vcmask 253952   ;;  %vm1871_vm1 = vmmov 0   ;;  %v1872_v1 = vmov 0.0  }
  0x69   : > { %1527 = vmatprep.subr.bf16.mxu1 %v1870_v0  ;;  %1524 = vmatprep.subr.bf16.mxu0 %v1870_v0  ;;  %270 = vst.msk [vmem:[#allocation2] sm:$0x1] %vm269_vm0, %v1872_v1  ;;  %271 = vst.msk [vmem:[#allocation3] sm:$0x1] %vm269_vm0, %v1872_v1  ;;  %v357_v2 = vld [vmem:[#allocation9] sm:$0xff]  ;;  %v358_v3 = vld [vmem:[#allocation9 + $0x8] sm:$0xff] }
  0x6a   : > { %1433 = vmatprep.mubr.msk.f32.mxu0 %vm1871_vm1, %v1872_v1  ;;  %1444 = vmatprep.mubr.msk.f32.mxu1 %vm1871_vm1, %v1872_v1  ;;  %v273_v4 = vld [vmem:[#allocation7] sm:$0xff]  ;;  %v2079_v5 = vpack.c.bf16 %v358_v3, %v357_v2  ;;  %v274_v6 = vld [vmem:[#allocation7 + $0x8] sm:$0xff]  ;;  %v272_v11 = vld [vmem:[%s223_s26] sm:$0xff]  ;;  %vm282_vm2 = vcmask 130048   ;;  %vm364_vm3 = vcmask 261120   ;;  %s1873_s24 = smov 32  }
  0x6b   : > { %v359_v7 = vld [vmem:[#allocation9 + $0x10] sm:$0xff]  ;;  %v1525_v8 = vpack.c.bf16 %v274_v6, %v273_v4  ;;  %v360_v9 = vld [vmem:[#allocation9 + $0x18] sm:$0xff]  ;;  %s1874_s12 = smov 64   ;;  %vm1219_vm4 = vcmask 1040384   ;;  %vm1221_vm5 = vcmask 1041408   ;;  %vm1223_vm6 = vcmask 1042432  }
  0x6c   : > { %1529 = vmatpush3.bf16.msra.mxu1 %v2079_v5  ;;  %v2082_v10 = vpack.c.bf16 %v360_v9, %v359_v7  ;;  %v1365_v13 = vld [vmem:[%s2214_s3] ss:$0 sm:$0xff]  ;;  %vm1225_vm7 = vcmask 1043456   ;;  %vm1227_vm8 = vcmask 1044480   ;;  %vm1229_vm9 = vcmask 1045504   ;;  %s1875_s30 = smov 96  }
  0x6d   : > { %1526 = vmatpush3.bf16.msra.mxu0 %v1525_v8  ;;  %1530 = vmatprep.subr.bf16.mxu1 %v1870_v0  ;;  %vm1231_vm10 = vcmask 1046528   ;;  %p258_p7 = scmp.lt.s32.totalorder %s1855_s18, 1  ;;  %vm1242_vm11 = vcmask 261127  }
  0x6e   : > { %1533 = vmatprep.subr.bf16.mxu0 %v1870_v0 }
  0x6f   : > { %s2236_s18 = smov (!%p258_p7, %s1855_s18), 1 }
  0x70   : > { %1434 = vmatmul.mubr.msk.f32.vlgmr.msra.gmra.mrb[0].mxu0 %vm282_vm2, %v272_v11  ;;  %1532 = vmatpush3.bf16.msra.mxu1 %v2082_v10  ;;  %v361_v12 = vld [vmem:[#allocation2] sm:$0x1]  ;;  %v1369_v21 = vld [vmem:[#allocation3] ss:$0 sm:$0xff]  ;;  %s1364_s5 = sshll.u32 %s2236_s18, 3 }
  0x71   : > { %1535 = vmatpush3.bf16.msra.mxu0 %v2079_v5  ;;  %1455 = vmatprep.mubr.msk.f32.mxu0 %vm1871_vm1, %v1872_v1  ;;  %s264_s9 = scalar_lea.vmem %s2215_s4, %s1364_s5 }
  0x72   : > { %1536 = vmatprep.subr.bf16.mxu0 %v1870_v0  ;;  %1539 = vmatprep.subr.bf16.mxu1 %v1870_v0 }
  0x73   : > { %1445 = vmatmul.mubr.msk.f32.vlgmr.msra.gmra.mrb[0].mxu1 %vm364_vm3, %v361_v12 }
  0x74   : > { %1541 = vmatpush3.bf16.msra.mxu1 %v2079_v5  ;;  %1466 = vmatprep.mubr.msk.f32.mxu1 %vm1871_vm1, %v1872_v1 }
  0x75   : > { %1538 = vmatpush3.bf16.msra.mxu0 %v2082_v10  ;;  %1542 = vmatprep.subr.bf16.mxu1 %v1870_v0 }
  0x76   : > { %1545 = vmatprep.subr.bf16.mxu0 %v1870_v0 }
  0x78   : > { %1544 = vmatpush3.bf16.msra.mxu1 %v2082_v10 }
  0x79   : > { %1551 = vmatprep.subr.bf16.mxu1 %v1870_v0 }
 0x143   : > { %v352_v14 = vpop.f32.mrb[0].mxu0 }
 0x144   : > { %v2104_v15 = vadd.f32 %v1365_v13, %v352_v14  ;;  %v1435_v16 = vpop.f32.mrb[1].mxu0 }
 0x146   : > { %v434_v17 = vpop.f32.mrb[0].mxu1 }
 0x147   : > { %v438_v18 = vadd.f32 %v434_v17, %v2104_v15  ;;  %v1446_v19 = vpop.f32.mrb[1].mxu1 }
 0x149   : > { %1659 = vtanh.f32 %v438_v18  ;;  %v1368_v22 = vmul.f32 -1.442695, %v438_v18 }
 0x14b   : > { %1661 = vpow2.f32 %v1368_v22 }
 0x153   : > { %v1660_v20 = vpop.eup %1659 }
 0x154   : > { %456 = vrot.lane.b32.xlu0 %v1660_v20, %s1873_s24 }
 0x155   : > { %v1662_v23 = vpop.eup %1661 }
 0x156   : > { %v442_v24 = vadd.f32 1.0, %v1662_v23 }
 0x158   : > { %451 = vrot.lane.b32.xlu0 %v1369_v21, %s1873_s24  ;;  %1663 = vrcp.f32 %v442_v24 }
 0x162   : > { %v1664_v25 = vpop.eup %1663 }
 0x1c6   : > { %v457_v26 = vpop.permute.xlu0 %456 }
 0x1c7   : > { %v459_v27 = vmul.f32 %v1664_v25, %v457_v26 }
 0x1c9   : > { %461 = vrot.lane.b32.xlu1 %v459_v27, %s1873_s24 }
 0x1ca   : > { %v452_v28 = vpop.permute.xlu0 %451 }
 0x1cb   : > { %v454_v29 = vmul.f32 %v1664_v25, %v452_v28 }
 0x23b   : > { %v462_v30 = vpop.permute.xlu1 %461 }
 0x23c   : > { %v464_v31 = vadd.f32 %v462_v30, %v454_v29 }
 0x23e   : > { %1665 = vtanh.f32 %v464_v31  ;;  %v558_v47 = vrot.slane %v464_v31, 7 }
 0x248   : > { %v1666_v32 = vpop.eup %1665 }
 0x249   : > { %467 = vrot.lane.b32.xlu1 %v1666_v32, %s1873_s24 }
 0x2bb   : > { %v468_v33 = vpop.permute.xlu1 %467 }
 0x2bc   : > { %v2111_v34 = vmul.f32 %v1664_v25, %v468_v33 }
 0x2be   : > { %472 = vrot.lane.b32.xlu0 %v2111_v34, %s1874_s12 }
 0x330   : > { %v473_v35 = vpop.permute.xlu0 %472 }
 0x331   : > { %1456 = vmatmul.mubr.msk.f32.vlgmr.msra.gmra.mrb[2].mxu0 %vm364_vm3, %v473_v35 }
 0x332   : > { %1547 = vmatpush3.bf16.msra.mxu0 %v2079_v5  ;;  %1477 = vmatprep.mubr.msk.f32.mxu0 %vm1871_vm1, %v1872_v1 }
 0x333   : > { %1548 = vmatprep.subr.bf16.mxu0 %v1870_v0 }
 0x336   : > { %1550 = vmatpush3.bf16.msra.mxu0 %v2082_v10 }
 0x337   : > { %1557 = vmatprep.subr.bf16.mxu0 %v1870_v0 }
 0x404   : > { %v542_v36 = vpop.f32.mrb[2].mxu0 }
 0x405   : > { %v547_v37 = vrot.slane %v542_v36, 7  ;;  %v1457_v38 = vpop.f32.mrb[3].mxu0 }
 0x407   : > { %v549_v39 = vadd.f32 %v547_v37, %v2104_v15 }
 0x409   : > { %1667 = vtanh.f32 %v549_v39  ;;  %v1371_v41 = vmul.f32 -1.442695, %v549_v39 }
 0x40b   : > { %1669 = vpow2.f32 %v1371_v41 }
 0x413   : > { %v1668_v40 = vpop.eup %1667 }
 0x414   : > { %562 = vrot.lane.b32.xlu1 %v1668_v40, %s1873_s24 }
 0x415   : > { %v1670_v42 = vpop.eup %1669 }
 0x416   : > { %v553_v43 = vadd.f32 1.0, %v1670_v42 }
 0x418   : > { %1671 = vrcp.f32 %v553_v43 }
 0x422   : > { %v1672_v44 = vpop.eup %1671 }
 0x423   : > { %v560_v48 = vmul.f32 %v1672_v44, %v558_v47 }
 0x486   : > { %v563_v45 = vpop.permute.xlu1 %562 }
 0x487   : > { %v565_v46 = vmul.f32 %v1672_v44, %v563_v45 }
 0x489   : > { %567 = vrot.lane.b32.xlu0 %v565_v46, %s1873_s24 }
 0x4fb   : > { %v568_v49 = vpop.permute.xlu0 %567 }
 0x4fc   : > { %v570_v50 = vadd.f32 %v568_v49, %v560_v48 }
 0x4fe   : > { %1673 = vtanh.f32 %v570_v50  ;;  %v665_v6 = vrot.slane %v570_v50, 7 }
 0x508   : > { %v1674_v51 = vpop.eup %1673 }
 0x509   : > { %573 = vrot.lane.b32.xlu1 %v1674_v51, %s1873_s24 }
 0x57b   : > { %v574_v52 = vpop.permute.xlu1 %573 }
 0x57c   : > { %v576_v53 = vmul.f32 %v1672_v44, %v574_v52 }
 0x57e   : > { %v578_v54 = vrot.slane %v576_v53, 1  ;;  %v1220_v14 = vsel %vm1219_vm4, %v2111_v34, %v576_v53 }
 0x580   : > { %579 = vrot.lane.b32.xlu0 %v578_v54, %s1874_s12 }
 0x5f2   : > { %v580_v55 = vpop.permute.xlu0 %579 }
 0x5f3   : > { %1467 = vmatmul.mubr.msk.f32.vlgmr.msra.gmra.mrb[2].mxu1 %vm364_vm3, %v580_v55 }
 0x5f4   : > { %1553 = vmatpush3.bf16.msra.mxu1 %v2079_v5  ;;  %1488 = vmatprep.mubr.msk.f32.mxu1 %vm1871_vm1, %v1872_v1 }
 0x5f5   : > { %1554 = vmatprep.subr.bf16.mxu1 %v1870_v0 }
 0x5f8   : > { %1556 = vmatpush3.bf16.msra.mxu1 %v2082_v10 }
 0x5f9   : > { %1563 = vmatprep.subr.bf16.mxu1 %v1870_v0 }
 0x6c6   : > { %v649_v56 = vpop.f32.mrb[2].mxu1 }
 0x6c7   : > { %v654_v57 = vrot.slane %v649_v56, 6  ;;  %v1468_v58 = vpop.f32.mrb[3].mxu1 }
 0x6c9   : > { %v656_v59 = vadd.f32 %v654_v57, %v2104_v15 }
 0x6cb   : > { %1675 = vtanh.f32 %v656_v59  ;;  %v1373_v61 = vmul.f32 -1.442695, %v656_v59 }
 0x6cd   : > { %1677 = vpow2.f32 %v1373_v61 }
 0x6d5   : > { %v1676_v60 = vpop.eup %1675 }
 0x6d6   : > { %669 = vrot.lane.b32.xlu1 %v1676_v60, %s1873_s24 }
 0x6d7   : > { %v1678_v62 = vpop.eup %1677 }
 0x6d8   : > { %v660_v63 = vadd.f32 1.0, %v1678_v62 }
 0x6da   : > { %1679 = vrcp.f32 %v660_v63 }
 0x6e4   : > { %v1680_v2 = vpop.eup %1679 }
 0x6e5   : > { %v667_v7 = vmul.f32 %v1680_v2, %v665_v6 }
 0x748   : > { %v670_v3 = vpop.permute.xlu1 %669 }
 0x749   : > { %v672_v4 = vmul.f32 %v1680_v2, %v670_v3 }
 0x74b   : > { %674 = vrot.lane.b32.xlu0 %v672_v4, %s1873_s24 }
 0x7bd   : > { %v675_v8 = vpop.permute.xlu0 %674 }
 0x7be   : > { %v677_v9 = vadd.f32 %v675_v8, %v667_v7 }
 0x7c0   : > { %1681 = vtanh.f32 %v677_v9  ;;  %v772_v30 = vrot.slane %v677_v9, 7 }
 0x7ca   : > { %v1682_v11 = vpop.eup %1681 }
 0x7cb   : > { %680 = vrot.lane.b32.xlu1 %v1682_v11, %s1873_s24 }
 0x83d   : > { %v681_v12 = vpop.permute.xlu1 %680 }
 0x83e   : > { %v683_v13 = vmul.f32 %v1680_v2, %v681_v12 }
 0x840   : > { %v685_v16 = vrot.slane %v683_v13, 2  ;;  %v1222_v17 = vsel %vm1221_vm5, %v1220_v14, %v683_v13 }
 0x842   : > { %686 = vrot.lane.b32.xlu0 %v685_v16, %s1874_s12 }
 0x8b4   : > { %v687_v18 = vpop.permute.xlu0 %686 }
 0x8b5   : > { %1478 = vmatmul.mubr.msk.f32.vlgmr.msra.gmra.mrb[4].mxu0 %vm364_vm3, %v687_v18 }
 0x8b6   : > { %1559 = vmatpush3.bf16.msra.mxu0 %v2079_v5  ;;  %1499 = vmatprep.mubr.msk.f32.mxu0 %vm1871_vm1, %v1872_v1 }
 0x8b7   : > { %1560 = vmatprep.subr.bf16.mxu0 %v1870_v0 }
 0x8ba   : > { %1562 = vmatpush3.bf16.msra.mxu0 %v2082_v10 }
 0x8bb   : > { %1569 = vmatprep.subr.bf16.mxu0 %v1870_v0 }
 0x988   : > { %v756_v19 = vpop.f32.mrb[4].mxu0 }
 0x989   : > { %v761_v20 = vrot.slane %v756_v19, 5  ;;  %v1479_v21 = vpop.f32.mrb[5].mxu0 }
 0x98b   : > { %v763_v22 = vadd.f32 %v761_v20, %v2104_v15 }
 0x98d   : > { %1683 = vtanh.f32 %v763_v22  ;;  %v1375_v24 = vmul.f32 -1.442695, %v763_v22 }
 0x98f   : > { %1685 = vpow2.f32 %v1375_v24 }
 0x997   : > { %v1684_v23 = vpop.eup %1683 }
 0x998   : > { %776 = vrot.lane.b32.xlu1 %v1684_v23, %s1873_s24 }
 0x999   : > { %v1686_v25 = vpop.eup %1685 }
 0x99a   : > { %v767_v26 = vadd.f32 1.0, %v1686_v25 }
 0x99c   : > { %1687 = vrcp.f32 %v767_v26 }
 0x9a6   : > { %v1688_v27 = vpop.eup %1687 }
 0x9a7   : > { %v774_v31 = vmul.f32 %v1688_v27, %v772_v30 }
 0xa0a   : > { %v777_v28 = vpop.permute.xlu1 %776 }
 0xa0b   : > { %v779_v29 = vmul.f32 %v1688_v27, %v777_v28 }
 0xa0d   : > { %781 = vrot.lane.b32.xlu0 %v779_v29, %s1873_s24 }
 0xa7f   : > { %v782_v32 = vpop.permute.xlu0 %781 }
 0xa80   : > { %v784_v33 = vadd.f32 %v782_v32, %v774_v31 }
 0xa82   : > { %1689 = vtanh.f32 %v784_v33  ;;  %v879_v51 = vrot.slane %v784_v33, 7 }
 0xa8c   : > { %v1690_v34 = vpop.eup %1689 }
 0xa8d   : > { %787 = vrot.lane.b32.xlu1 %v1690_v34, %s1873_s24 }
 0xaff   : > { %v788_v35 = vpop.permute.xlu1 %787 }
 0xb00   : > { %v790_v36 = vmul.f32 %v1688_v27, %v788_v35 }
 0xb02   : > { %v792_v37 = vrot.slane %v790_v36, 3  ;;  %v1224_v38 = vsel %vm1223_vm6, %v1222_v17, %v790_v36 }
 0xb04   : > { %793 = vrot.lane.b32.xlu0 %v792_v37, %s1874_s12 }
 0xb76   : > { %v794_v39 = vpop.permute.xlu0 %793 }
 0xb77   : > { %1489 = vmatmul.mubr.msk.f32.vlgmr.msra.gmra.mrb[4].mxu1 %vm364_vm3, %v794_v39 }
 0xb78   : > { %1565 = vmatpush3.bf16.msra.mxu1 %v2079_v5  ;;  %1510 = vmatprep.mubr.msk.f32.mxu1 %vm1871_vm1, %v1872_v1 }
 0xb79   : > { %1566 = vmatprep.subr.bf16.mxu1 %v1870_v0 }
 0xb7c   : > { %1568 = vmatpush3.bf16.msra.mxu1 %v2082_v10 }
 0xc4a   : > { %v863_v40 = vpop.f32.mrb[4].mxu1 }
 0xc4b   : > { %v868_v41 = vrot.slane %v863_v40, 4  ;;  %v1490_v42 = vpop.f32.mrb[5].mxu1 }
 0xc4d   : > { %v870_v43 = vadd.f32 %v868_v41, %v2104_v15 }
 0xc4f   : > { %1691 = vtanh.f32 %v870_v43  ;;  %v1377_v45 = vmul.f32 -1.442695, %v870_v43 }
 0xc51   : > { %1693 = vpow2.f32 %v1377_v45 }
 0xc59   : > { %v1692_v44 = vpop.eup %1691 }
 0xc5a   : > { %883 = vrot.lane.b32.xlu1 %v1692_v44, %s1873_s24 }
 0xc5b   : > { %v1694_v46 = vpop.eup %1693 }
 0xc5c   : > { %v874_v47 = vadd.f32 1.0, %v1694_v46 }
 0xc5e   : > { %1695 = vrcp.f32 %v874_v47 }
 0xc68   : > { %v1696_v48 = vpop.eup %1695 }
 0xc69   : > { %v881_v52 = vmul.f32 %v1696_v48, %v879_v51 }
 0xccc   : > { %v884_v49 = vpop.permute.xlu1 %883 }
 0xccd   : > { %v886_v50 = vmul.f32 %v1696_v48, %v884_v49 }
 0xccf   : > { %888 = vrot.lane.b32.xlu0 %v886_v50, %s1873_s24 }
 0xd41   : > { %v889_v53 = vpop.permute.xlu0 %888 }
 0xd42   : > { %v891_v54 = vadd.f32 %v889_v53, %v881_v52 }
 0xd44   : > { %1697 = vtanh.f32 %v891_v54 }
 0xd4e   : > { %v1698_v55 = vpop.eup %1697 }
 0xd4f   : > { %894 = vrot.lane.b32.xlu1 %v1698_v55, %s1873_s24 }
 0xdc1   : > { %v895_v56 = vpop.permute.xlu1 %894 }
 0xdc2   : > { %v897_v57 = vmul.f32 %v1696_v48, %v895_v56 }
 0xdc4   : > { %v899_v58 = vrot.slane %v897_v57, 4  ;;  %v1226_v59 = vsel %vm1225_vm7, %v1224_v38, %v897_v57 }
 0xdc6   : > { %900 = vrot.lane.b32.xlu0 %v899_v58, %s1874_s12 }
 0xe38   : > { %v901_v60 = vpop.permute.xlu0 %900 }
 0xe39   : > { %1500 = vmatmul.mubr.msk.f32.vlgmr.msra.gmra.mrb[6].mxu0 %vm364_vm3, %v901_v60 }
 0xe3a   : > { %1571 = vmatpush3.bf16.msra.mxu0 %v2079_v5  ;;  %1521 = vmatprep.mubr.msk.f32.mxu0 %vm1871_vm1, %v1872_v1 }
 0xe3b   : > { %1572 = vmatprep.subr.bf16.mxu0 %v1870_v0  ;;  %v986_v0 = vrot.slane %v891_v54, 7 }
 0xe3e   : > { %1574 = vmatpush3.bf16.msra.mxu0 %v2082_v10 }
 0xf0c   : > { %v970_v61 = vpop.f32.mrb[6].mxu0 }
 0xf0d   : > { %v975_v62 = vrot.slane %v970_v61, 3  ;;  %v1501_v63 = vpop.f32.mrb[7].mxu0 }
 0xf0f   : > { %v977_v2 = vadd.f32 %v975_v62, %v2104_v15 }
 0xf11   : > { %1699 = vtanh.f32 %v977_v2  ;;  %v1379_v4 = vmul.f32 -1.442695, %v977_v2 }
 0xf13   : > { %1701 = vpow2.f32 %v1379_v4 }
 0xf1b   : > { %v1700_v3 = vpop.eup %1699 }
 0xf1c   : > { %990 = vrot.lane.b32.xlu1 %v1700_v3, %s1873_s24 }
 0xf1d   : > { %v1702_v6 = vpop.eup %1701 }
 0xf1e   : > { %v981_v5 = vadd.f32 1.0, %v1702_v6 }
 0xf20   : > { %1703 = vrcp.f32 %v981_v5 }
 0xf2a   : > { %v1704_v7 = vpop.eup %1703 }
 0xf2b   : > { %v988_v10 = vmul.f32 %v1704_v7, %v986_v0 }
 0xf8e   : > { %v991_v1 = vpop.permute.xlu1 %990 }
 0xf8f   : > { %v993_v8 = vmul.f32 %v1704_v7, %v991_v1 }
 0xf91   : > { %995 = vrot.lane.b32.xlu0 %v993_v8, %s1873_s24 }
0x1003   : > { %v996_v9 = vpop.permute.xlu0 %995 }
0x1004   : > { %v998_v11 = vadd.f32 %v996_v9, %v988_v10 }
0x1006   : > { %1705 = vtanh.f32 %v998_v11  ;;  %v1093_v30 = vrot.slane %v998_v11, 7 }
0x1010   : > { %v1706_v12 = vpop.eup %1705 }
0x1011   : > { %1001 = vrot.lane.b32.xlu1 %v1706_v12, %s1873_s24 }
0x1083   : > { %v1002_v13 = vpop.permute.xlu1 %1001 }
0x1084   : > { %v1004_v14 = vmul.f32 %v1704_v7, %v1002_v13 }
0x1086   : > { %v1006_v16 = vrot.slane %v1004_v14, 5  ;;  %v1228_v17 = vsel %vm1227_vm8, %v1226_v59, %v1004_v14 }
0x1088   : > { %1007 = vrot.lane.b32.xlu0 %v1006_v16, %s1874_s12 }
0x10fa   : > { %v1008_v18 = vpop.permute.xlu0 %1007 }
0x10fb   : > { %1511 = vmatmul.mubr.msk.f32.vlgmr.msra.gmra.mrb[6].mxu1 %vm364_vm3, %v1008_v18 }
0x11ce   : > { %v1077_v19 = vpop.f32.mrb[6].mxu1 }
0x11cf   : > { %v1082_v20 = vrot.slane %v1077_v19, 2  ;;  %v1512_v21 = vpop.f32.mrb[7].mxu1 }
0x11d1   : > { %v1084_v22 = vadd.f32 %v1082_v20, %v2104_v15 }
0x11d3   : > { %1707 = vtanh.f32 %v1084_v22  ;;  %v1381_v24 = vmul.f32 -1.442695, %v1084_v22 }
0x11d5   : > { %1709 = vpow2.f32 %v1381_v24 }
0x11dd   : > { %v1708_v23 = vpop.eup %1707 }
0x11de   : > { %1097 = vrot.lane.b32.xlu1 %v1708_v23, %s1873_s24 }
0x11df   : > { %v1710_v25 = vpop.eup %1709 }
0x11e0   : > { %v1088_v26 = vadd.f32 1.0, %v1710_v25 }
0x11e2   : > { %1711 = vrcp.f32 %v1088_v26 }
0x11ec   : > { %v1712_v27 = vpop.eup %1711 }
0x11ed   : > { %v1095_v31 = vmul.f32 %v1712_v27, %v1093_v30 }
0x1250   : > { %v1098_v28 = vpop.permute.xlu1 %1097 }
0x1251   : > { %v1100_v29 = vmul.f32 %v1712_v27, %v1098_v28 }
0x1253   : > { %1102 = vrot.lane.b32.xlu0 %v1100_v29, %s1873_s24 }
0x12c5   : > { %v1103_v32 = vpop.permute.xlu0 %1102 }
0x12c6   : > { %v1105_v33 = vadd.f32 %v1103_v32, %v1095_v31 }
0x12c8   : > { %1713 = vtanh.f32 %v1105_v33  ;;  %v1200_v51 = vrot.slane %v1105_v33, 7 }
0x12d2   : > { %v1714_v34 = vpop.eup %1713 }
0x12d3   : > { %1108 = vrot.lane.b32.xlu1 %v1714_v34, %s1873_s24 }
0x1345   : > { %v1109_v35 = vpop.permute.xlu1 %1108 }
0x1346   : > { %v1111_v36 = vmul.f32 %v1712_v27, %v1109_v35 }
0x1348   : > { %v1113_v37 = vrot.slane %v1111_v36, 6  ;;  %v1230_v38 = vsel %vm1229_vm9, %v1228_v17, %v1111_v36 }
0x134a   : > { %1114 = vrot.lane.b32.xlu0 %v1113_v37, %s1874_s12 }
0x13bc   : > { %v1115_v39 = vpop.permute.xlu0 %1114 }
0x13bd   : > { %1522 = vmatmul.mubr.msk.f32.vlgmr.msra.gmra.mrb[8].mxu0 %vm364_vm3, %v1115_v39 }
0x1490   : > { %v1184_v40 = vpop.f32.mrb[8].mxu0 }
0x1491   : > { %v1189_v41 = vrot.slane %v1184_v40, 1  ;;  %v1523_v42 = vpop.f32.mrb[9].mxu0 }
0x1493   : > { %v1191_v43 = vadd.f32 %v1189_v41, %v2104_v15 }
0x1495   : > { %1715 = vtanh.f32 %v1191_v43  ;;  %v1383_v45 = vmul.f32 -1.442695, %v1191_v43 }
0x1497   : > { %1717 = vpow2.f32 %v1383_v45 }
0x149f   : > { %v1716_v44 = vpop.eup %1715 }
0x14a0   : > { %1204 = vrot.lane.b32.xlu1 %v1716_v44, %s1873_s24 }
0x14a1   : > { %v1718_v46 = vpop.eup %1717 }
0x14a2   : > { %v1195_v47 = vadd.f32 1.0, %v1718_v46 }
0x14a4   : > { %1719 = vrcp.f32 %v1195_v47 }
0x14ae   : > { %v1720_v48 = vpop.eup %1719 }
0x14af   : > { %v1202_v52 = vmul.f32 %v1720_v48, %v1200_v51 }
0x1512   : > { %v1205_v49 = vpop.permute.xlu1 %1204 }
0x1513   : > { %v1207_v50 = vmul.f32 %v1720_v48, %v1205_v49 }
0x1515   : > { %1209 = vrot.lane.b32.xlu0 %v1207_v50, %s1873_s24 }
0x1587   : > { %v1210_v53 = vpop.permute.xlu0 %1209 }
0x1588   : > { %v1212_v15 = vadd.f32 %v1210_v53, %v1202_v52 }
0x158a   : > { %1721 = vtanh.f32 %v1212_v15 }
0x1594   : > { %v1722_v54 = vpop.eup %1721 }
0x1595   : > { %1215 = vrot.lane.b32.xlu1 %v1722_v54, %s1873_s24 }
0x1607   : > { %v1216_v55 = vpop.permute.xlu1 %1215 }
0x1608   : > { %v1218_v56 = vmul.f32 %v1720_v48, %v1216_v55 }
0x160a   : > { %1239 = vrot.lane.b32.xlu1 %v1218_v56, %s1874_s12  ;;  %v1232_v57 = vsel %vm1231_vm10, %v1230_v38, %v1218_v56 }
0x160b   : > { %1234 = vrot.lane.b32.xlu0 %v1232_v57, %s1874_s12 }
0x160f   : > { %1245 = vrot.lane.b32.xlu0 %v1212_v15, %s1875_s30 }
0x167c   : > { %v1240_v58 = vpop.permute.xlu1 %1239 }
0x167d   : > { %1243 = vst.msk [vmem:[#allocation2 - $0x7] sm:$0x80] %vm1242_vm11, %v1240_v58  ;;  %v1235_v59 = vpop.permute.xlu0 %1234 }
0x167e   : > { %1237 = vst.msk [vmem:[%s264_s9] sm:$0xff] %vm364_vm3, %v1235_v59 }
0x1681   : > { %v1246_v60 = vpop.permute.xlu0 %1245 }
0x1682   : > { %1248 = vst.msk [vmem:[#allocation3 - $0x7] sm:$0x80] %vm1242_vm11, %v1246_v60 }
0x1683 PF: > { %s18_s20 = sadd.s32 1, %s1863_s20   ;;  %s2228_s15 = smov %s1847_s16 }
0x1684   : > { %p15_p9 = scmp.ge.s32.totalorder %s18_s20, 4   ;;  %s2229_s16 = smov %s1851_s17 }
0x1685   : > { %s2230_s17 = smov %s2017_s25  ;;  %s2231_s18 = smov %s1859_s19 }
0x1686   : > { %s2232_s19 = smov %s2234_s10  ;;  %17 = sbr.rel (!%p15_p9) target bundleno = 5 (0x5), region = 88 }
0x168d   :  { %1274 = vsyncpa [#allocation6], 1 }
0x168e   :  { %1276 = vsyncpa [#allocation6 + $0x1], 1 }
0x168f   :  { %1277 = vsyncpa [#allocation8], 1 }

</bundles_post_ra>
